<compile_context>
chip_gen: v7x
topology: tpu7x:2x2x1
jax: 0.10.0
libtpu: 0.0.40
codegen_flags: <defaults>
</compile_context>

<pallas_src>
import functools
import math

import jax
import jax.numpy as jnp
from jax import lax
from jax.experimental import pallas as pl
from jax.experimental.pallas import tpu as pltpu

_MEXHAT_C = 2.0 / (math.sqrt(3.0) * math.pi ** 0.25)
_BN_EVAL_SCALE = 1.0 / math.sqrt(1.0 + 1e-5)   # eval-mode BatchNorm1d, fresh stats
_REVIN_EPS = 1e-5
_NEG_BIG = -1e30
_NUM_EXPERTS = 4
_GRP = 128                                      # wave-loop lane-group size


def _round_up(v, m):
    return (v + m - 1) // m * m


def _device_tuning():
    """Per-generation knobs: bf16 math + scoped-VMEM limit."""
    try:
        kind = jax.devices()[0].device_kind.lower()
    except Exception:
        kind = ""
    use_bf16 = ("v6" in kind) or ("v7" in kind)          # bf16 VPU/EUP present
    if "v7" in kind:
        vmem_limit = 48 * 1024 * 1024                    # 64 MiB physical per TC
    elif ("v4" in kind) or ("v5" in kind) or ("v6" in kind):
        vmem_limit = 96 * 1024 * 1024                    # 128 MiB physical
    else:
        vmem_limit = None
    return use_bf16, vmem_limit


def _dense_rmok_kernel(x_ref, aff_ref, wa_ref, wb_ref, bias_ref,
                       wt_ref, ws2_ref, wA_ref, wB_ref,
                       o_ref, xw_ref, wacc_ref,
                       *, L, P_pad, wave_dtype):
    f32 = jnp.float32
    x = x_ref[...].astype(f32)                  # (TM, L_pad), zero-padded lanes
    aw = aff_ref[:, 0:1]                        # per-row RevIN affine weight
    ab = aff_ref[:, 1:2]                        # per-row RevIN affine bias

    # ---- RevIN 'norm' (zero-padded lanes are exact with sum/L formulation) ----
    inv_L = 1.0 / L
    mean = jnp.sum(x, axis=-1, keepdims=True) * inv_L
    var = jnp.sum(x * x, axis=-1, keepdims=True) * inv_L - mean * mean
    inv_std = lax.rsqrt(var + _REVIN_EPS)
    xn = (x - mean) * (inv_std * aw) + ab       # (TM, L_pad) f32
    # dropout: eval-mode identity

    # ---- fused gate + 2x Taylor experts: one lane-dense (TM, 2*P_pad + 128) ----
    mdtype = wa_ref.dtype                       # bf16 on v6e/v7x, f32 on v5e
    xm = xn.astype(mdtype)
    x2m = (xn * xn).astype(mdtype)
    res = (jnp.dot(xm, wa_ref[...], preferred_element_type=f32)
           + jnp.dot(x2m, wb_ref[...], preferred_element_type=f32)
           + bias_ref[...])
    y0 = res[:, :P_pad]                         # Taylor expert 0
    y1 = res[:, P_pad:2 * P_pad]                # Taylor expert 1
    logits = res[:, 2 * P_pad:]                 # (TM, 128); padded lanes biased -1e30
    logits = logits - jnp.max(logits, axis=-1, keepdims=True)
    pexp = jnp.exp(logits)
    score = pexp * pl.reciprocal(jnp.sum(pexp, axis=-1, keepdims=True), approx=True)

    # ---- Wave-KAN experts (mexican hat), both experts fused along the P axis ----
    # Per-timestep 2-D accumulation over (TM, 2*P_pad): no 3-D temporaries,
    # no axis-1 reduce; constants folded: a = (x-t)^2*s2, mh = exp(a)*(a*wA + wB).
    xw_ref[...] = xn.astype(wave_dtype)                 # cast once per tile
    wacc_ref[...] = jnp.zeros_like(wacc_ref)

    def wave_step(x_col, idx):
        t_row = wt_ref[pl.ds(idx, 1), :]                # (1, 2*P_pad)
        s2_row = ws2_ref[pl.ds(idx, 1), :]
        a_row = wA_ref[pl.ds(idx, 1), :]
        b_row = wB_ref[pl.ds(idx, 1), :]
        d = x_col - t_row                               # (TM, 2*P_pad)
        a = (d * d) * s2_row
        mh = jnp.exp(a) * (a * a_row + b_row)
        wacc_ref[...] += mh.astype(jnp.float32)         # f32 accumulate

    n_full = L // _GRP
    rem = L - n_full * _GRP
    if n_full > 0:
        @pl.loop(0, n_full)                             # bounded-size loop body
        def _group(g):
            start = pl.multiple_of(g * _GRP, _GRP)      # 128-aligned lane offset
            xg = xw_ref[:, pl.ds(start, _GRP)]          # (TM, 128) wave dtype
            for t in range(_GRP):                       # static inner unroll
                wave_step(xg[:, t:t + 1], start + t)
    if rem > 0:
        base = n_full * _GRP
        for t in range(rem):                            # static tail (offsets static)
            c = base + t
            wave_step(xw_ref[:, c:c + 1], c)

    wacc = wacc_ref[...]
    y2 = wacc[:, :P_pad]                                # Wave expert 0
    y3 = wacc[:, P_pad:]                                # Wave expert 1

    # ---- mixture: einsum('blE, bE -> bl') with E = 4 ----
    pred = (y0 * score[:, 0:1] + y1 * score[:, 1:2]
            + y2 * score[:, 2:3] + y3 * score[:, 3:4])  # (TM, P_pad)

    # ---- RevIN 'denorm' (exact divide) ----
    stdev = (var + _REVIN_EPS) * inv_std                # = sqrt(var + eps)
    pred = (pred - ab) / (aw + _REVIN_EPS) * stdev + mean
    o_ref[...] = pred.astype(o_ref.dtype)


def init_params(key, hist_len, pred_len, var_num, num_experts=4):
    L, P, E = hist_len, pred_len, num_experts
    ks = jax.random.split(key, 8)

    # gate = nn.Linear(hist_len, num_experts); stored pre-transposed as (L, E)
    bound_g = 1.0 / math.sqrt(L)
    gate_w = jax.random.uniform(ks[0], (L, E), jnp.float32, -bound_g, bound_g)
    gate_b = jax.random.uniform(ks[1], (1, E), jnp.float32, -bound_g, bound_g)

    def taylor(k):
        # coeffs: (out, in, order) = (P, L, 3), init randn*0.01; bias zeros
        coeffs = 0.01 * jax.random.normal(k, (P, L, 3), jnp.float32)
        bias = jnp.zeros((1, P), jnp.float32)
        c1 = coeffs[:, :, 1].T                          # (L, P) for x   @ C1
        c2 = coeffs[:, :, 2].T                          # (L, P) for x^2 @ C2
        k0 = coeffs[:, :, 0].sum(axis=1)[None, :] + bias
        return c1, c2, k0

    t0_c1, t0_c2, t0_k = taylor(ks[2])
    t1_c1, t1_c2, t1_k = taylor(ks[3])

    def wave(k):
        scale = jnp.ones((P, L), jnp.float32)           # torch.ones init
        trans = jnp.zeros((P, L), jnp.float32)          # torch.zeros init
        bound = math.sqrt(6.0 / ((1.0 + 5.0) * L))      # kaiming_uniform(a=sqrt(5))
        ww = jax.random.uniform(k, (P, L), jnp.float32, -bound, bound)
        return scale, trans, ww

    w0_s, w0_t, w0_w = wave(ks[4])
    w1_s, w1_t, w1_w = wave(ks[5])

    rev_w = jnp.ones((var_num,), jnp.float32)           # RevIN affine_weight
    rev_b = jnp.zeros((var_num,), jnp.float32)          # RevIN affine_bias

    return dict(gate_w=gate_w, gate_b=gate_b,
                t0_c1=t0_c1, t0_c2=t0_c2, t0_k=t0_k,
                t1_c1=t1_c1, t1_c2=t1_c2, t1_k=t1_k,
                w0_s=w0_s, w0_t=w0_t, w0_w=w0_w,
                w1_s=w1_s, w1_t=w1_t, w1_w=w1_w,
                rev_w=rev_w, rev_b=rev_b)


def pack_params(params, *, use_bf16=None):
    """One-time host-side packing (hoisted out of the per-call path)."""
    auto_bf16, vmem_limit = _device_tuning()
    if use_bf16 is None:
        use_bf16 = auto_bf16
    wdtype = jnp.bfloat16 if use_bf16 else jnp.float32
    f32 = jnp.float32

    L, P = params["t0_c1"].shape
    E = params["gate_w"].shape[1]
    assert E == _NUM_EXPERTS
    L_pad = _round_up(L, 128)
    P_pad = _round_up(max(P, 1), 128)
    GP = 128
    C = 2 * P_pad + GP
    P2 = 2 * P_pad

    # fused gate + Taylor weights: xn @ wa + xn^2 @ wb + bias -> [y0 | y1 | logits]
    wa = jnp.zeros((L_pad, C), f32)
    wa = wa.at[:L, :P].set(params["t0_c1"])
    wa = wa.at[:L, P_pad:P_pad + P].set(params["t1_c1"])
    wa = wa.at[:L, 2 * P_pad:2 * P_pad + E].set(params["gate_w"])
    wb = jnp.zeros((L_pad, C), f32)
    wb = wb.at[:L, :P].set(params["t0_c2"])
    wb = wb.at[:L, P_pad:P_pad + P].set(params["t1_c2"])
    bias = jnp.zeros((1, C), f32)
    bias = bias.at[:, 2 * P_pad + E:].set(_NEG_BIG)     # padded gate lanes -> 0 softmax
    bias = bias.at[:, :P].set(params["t0_k"])
    bias = bias.at[:, P_pad:P_pad + P].set(params["t1_k"])
    bias = bias.at[:, 2 * P_pad:2 * P_pad + E].set(params["gate_b"])

    # wavelet params, constants folded:  a = (x-t)^2 * s2,  mh = exp(a)*(a*wA + wB)
    #   s2 = -0.5/scale^2,  wA = -2*C_mh*bn*w,  wB = -C_mh*bn*w
    def fold(scale, trans, weight):                     # inputs (P, L)
        s2 = -0.5 / (scale * scale)
        cw = (_MEXHAT_C * _BN_EVAL_SCALE) * weight
        return trans.T, s2.T, (-2.0 * cw).T, (-cw).T    # each (L, P)

    f0 = fold(params["w0_s"], params["w0_t"], params["w0_w"])
    f1 = fold(params["w1_s"], params["w1_t"], params["w1_w"])

    def put2(a0, a1):                                   # -> (L_pad, 2*P_pad), zero pads
        out = jnp.zeros((L_pad, P2), f32)
        out = out.at[:L, :P].set(a0)
        out = out.at[:L, P_pad:P_pad + P].set(a1)
        return out

    wt = put2(f0[0], f1[0])
    ws2 = put2(f0[1], f1[1])
    wA = put2(f0[2], f1[2])
    wB = put2(f0[3], f1[3])

    return dict(
        wa=wa.astype(wdtype), wb=wb.astype(wdtype), bias=bias,
        wt=wt.astype(wdtype), ws2=ws2.astype(wdtype),
        wA=wA.astype(wdtype), wB=wB.astype(wdtype),
        rev_w=params["rev_w"].astype(f32), rev_b=params["rev_b"].astype(f32),
        meta=dict(L=L, P=P, E=E, L_pad=L_pad, P_pad=P_pad, C=C,
                  wave_dtype=wdtype, vmem_limit=vmem_limit),
    )


def dense_rmok_forward(x, packed, *, tile_m=256):
    """x: (B, L, N) float32 -> (B, P, N) float32."""
    meta = packed["meta"]
    L, P, L_pad, P_pad = meta["L"], meta["P"], meta["L_pad"], meta["P_pad"]
    wave_dtype, vmem_limit = meta["wave_dtype"], meta["vmem_limit"]
    f32 = jnp.float32

    B, Lx, N = x.shape
    assert Lx == L
    M = B * N

    # per-call work: rows + lane padding only (weights were packed once)
    x_rows = jnp.transpose(x, (0, 2, 1)).reshape(M, L).astype(f32)
    aw_rows = jnp.tile(packed["rev_w"], (B,))[:, None]
    ab_rows = jnp.tile(packed["rev_b"], (B,))[:, None]

    # >=2 grid steps when possible so the 'parallel' axis shards across v7x's 2 TCs
    tile = max(8, min(tile_m, _round_up((M + 1) // 2, 8)))
    M_pad = _round_up(M, tile)

    x_pad = jnp.zeros((M_pad, L_pad), f32).at[:M, :L].set(x_rows)
    aff = jnp.zeros((M_pad, 128), f32)
    aff = aff.at[:M, 0:1].set(aw_rows).at[:M, 1:2].set(ab_rows)
    aff = aff.at[M:, 0].set(1.0)                       # pad rows: aw=1 keeps denorm finite

    kernel = functools.partial(_dense_rmok_kernel, L=L, P_pad=P_pad,
                               wave_dtype=wave_dtype)

    # constant-index weights: single-buffered (no point double-buffering)
    def w_spec(a):
        return pl.BlockSpec(a.shape, lambda i: (0, 0), pipeline_mode=pl.Buffered(1))

    out_rows = pl.pallas_call(
        kernel,
        out_shape=jax.ShapeDtypeStruct((M_pad, P_pad), f32),
        grid_spec=pltpu.PrefetchScalarGridSpec(
            num_scalar_prefetch=0,
            grid=(M_pad // tile,),
            in_specs=[pl.BlockSpec((tile, L_pad), lambda i: (i, 0)),
                      pl.BlockSpec((tile, 128), lambda i: (i, 0)),
                      w_spec(packed["wa"]), w_spec(packed["wb"]), w_spec(packed["bias"]),
                      w_spec(packed["wt"]), w_spec(packed["ws2"]),
                      w_spec(packed["wA"]), w_spec(packed["wB"])],
            out_specs=pl.BlockSpec((tile, P_pad), lambda i: (i, 0)),
            scratch_shapes=[pltpu.VMEM((tile, L_pad), wave_dtype),
                            pltpu.VMEM((tile, 2 * P_pad), jnp.float32)]),
        compiler_params=pltpu.CompilerParams(
            dimension_semantics=("parallel",),
            vmem_limit_bytes=vmem_limit),
    )(x_pad, aff, packed["wa"], packed["wb"], packed["bias"],
      packed["wt"], packed["ws2"], packed["wA"], packed["wB"])

    return out_rows[:M, :P].reshape(B, N, P).transpose(0, 2, 1)


def dense_rmok_reference(x, params):
    """Pure-JAX reference with the original (un-fused, f32, exact-div) math."""
    B, L, N = x.shape
    mean = jnp.mean(x, axis=1, keepdims=True)                      # (B,1,N)
    stdev = jnp.sqrt(jnp.var(x, axis=1, keepdims=True) + _REVIN_EPS)
    xn = (x - mean) / stdev * params["rev_w"] + params["rev_b"]
    xr = jnp.transpose(xn, (0, 2, 1)).reshape(B * N, L)            # (M, L)

    score = jax.nn.softmax(xr @ params["gate_w"] + params["gate_b"], axis=-1)

    y0 = xr @ params["t0_c1"] + (xr ** 2) @ params["t0_c2"] + params["t0_k"]
    y1 = xr @ params["t1_c1"] + (xr ** 2) @ params["t1_c2"] + params["t1_k"]

    def wave(s, t, w):
        xs = (xr[:, None, :] - t[None]) / s[None]
        mh = _MEXHAT_C * (xs * xs - 1.0) * jnp.exp(-0.5 * xs * xs)
        return jnp.sum(mh * w[None], axis=-1) * _BN_EVAL_SCALE

    y2 = wave(params["w0_s"], params["w0_t"], params["w0_w"])
    y3 = wave(params["w1_s"], params["w1_t"], params["w1_w"])

    eo = jnp.stack([y0, y1, y2, y3], axis=-1)                      # (M, P, E)
    pred = jnp.einsum('ble,be->bl', eo, score)                     # (M, P)

    P = pred.shape[1]
    pred = pred.reshape(B, N, P).transpose(0, 2, 1)                # (B, P, N)
    pred = (pred - params["rev_b"]) / (params["rev_w"] + _REVIN_EPS) * stdev + mean
    return pred


if __name__ == "__main__":
    B, L, N, P = 2, 16, 8, 16          # batch, hist_len, var_num, pred_len
    key = jax.random.PRNGKey(0)
    kx, kp = jax.random.split(key)
    x = jax.random.normal(kx, (B, L, N), jnp.float32)
    params = init_params(kp, hist_len=L, pred_len=P, var_num=N)

    packed = pack_params(params)       # one-time packing, hoisted out of forward

    out = jax.block_until_ready(dense_rmok_forward(x, packed))
    ref = dense_rmok_reference(x, params)

    tol = 5e-2 if packed["meta"]["wave_dtype"] == jnp.bfloat16 else 1e-2
    assert out.shape == (B, P, N)
    err = float(jnp.max(jnp.abs(out - ref)))
    assert err < tol, f"max abs err {err}"
    print("KERNEL_OK")
</pallas_src>

<mosaic_0001>
module attributes {stable_mosaic.version = 11 : i64} {
  func.func @_dense_rmok_kernel(%arg0: i32, %arg1: memref<8x128xf32, #tpu.memory_space<vmem>>, %arg2: memref<8x128xf32, #tpu.memory_space<vmem>>, %arg3: memref<128x384xf32, #tpu.memory_space<vmem>>, %arg4: memref<128x384xf32, #tpu.memory_space<vmem>>, %arg5: memref<1x384xf32, #tpu.memory_space<vmem>>, %arg6: memref<128x256xf32, #tpu.memory_space<vmem>>, %arg7: memref<128x256xf32, #tpu.memory_space<vmem>>, %arg8: memref<128x256xf32, #tpu.memory_space<vmem>>, %arg9: memref<128x256xf32, #tpu.memory_space<vmem>>, %arg10: memref<8x128xf32, #tpu.memory_space<vmem>>, %arg11: memref<8x128xf32, #tpu.memory_space<vmem>>, %arg12: memref<8x256xf32, #tpu.memory_space<vmem>>) attributes {dimension_semantics = [#tpu.dimension_semantics<parallel>], iteration_bounds = array<i64: 2>, scalar_prefetch = 0 : i64, scratch_operands = 2 : i64, tpu.core_type = #tpu.core_type<tc>, window_params = [{transform_indices = @transform_0, window_bounds = array<i64: 8, 128>}, {transform_indices = @transform_1, window_bounds = array<i64: 8, 128>}, {pipeline_mode = #tpu.pipeline_mode<synchronous>, transform_indices = @transform_2, window_bounds = array<i64: 128, 384>}, {pipeline_mode = #tpu.pipeline_mode<synchronous>, transform_indices = @transform_3, window_bounds = array<i64: 128, 384>}, {pipeline_mode = #tpu.pipeline_mode<synchronous>, transform_indices = @transform_4, window_bounds = array<i64: 1, 384>}, {pipeline_mode = #tpu.pipeline_mode<synchronous>, transform_indices = @transform_5, window_bounds = array<i64: 128, 256>}, {pipeline_mode = #tpu.pipeline_mode<synchronous>, transform_indices = @transform_6, window_bounds = array<i64: 128, 256>}, {pipeline_mode = #tpu.pipeline_mode<synchronous>, transform_indices = @transform_7, window_bounds = array<i64: 128, 256>}, {pipeline_mode = #tpu.pipeline_mode<synchronous>, transform_indices = @transform_8, window_bounds = array<i64: 128, 256>}, {transform_indices = @transform_9, window_bounds = array<i64: 8, 128>}]} {
    %c0 = arith.constant 0 : index
    %c0_0 = arith.constant 0 : index
    %0 = vector.load %arg1[%c0, %c0_0] : memref<8x128xf32, #tpu.memory_space<vmem>>, vector<8x128xf32>
    %c0_1 = arith.constant 0 : index
    %c0_2 = arith.constant 0 : index
    %1 = vector.load %arg2[%c0_1, %c0_2] : memref<8x128xf32, #tpu.memory_space<vmem>>, vector<8x1xf32>
    %c0_3 = arith.constant 0 : index
    %c1 = arith.constant 1 : index
    %2 = vector.load %arg2[%c0_3, %c1] : memref<8x128xf32, #tpu.memory_space<vmem>>, vector<8x1xf32>
    %cst = arith.constant dense<0.000000e+00> : vector<8xf32>
    %3 = vector.multi_reduction <add>, %0, %cst [1] : vector<8x128xf32> to vector<8xf32>
    %4 = vector.shape_cast %3 : vector<8xf32> to vector<8x1xf32>
    %cst_4 = arith.constant 6.250000e-02 : f32
    %5 = vector.broadcast %cst_4 : f32 to vector<8x1xf32>
    %6 = arith.mulf %4, %5 : vector<8x1xf32>
    %7 = arith.mulf %0, %0 : vector<8x128xf32>
    %cst_5 = arith.constant dense<0.000000e+00> : vector<8xf32>
    %8 = vector.multi_reduction <add>, %7, %cst_5 [1] : vector<8x128xf32> to vector<8xf32>
    %9 = vector.shape_cast %8 : vector<8xf32> to vector<8x1xf32>
    %cst_6 = arith.constant 6.250000e-02 : f32
    %10 = vector.broadcast %cst_6 : f32 to vector<8x1xf32>
    %11 = arith.mulf %9, %10 : vector<8x1xf32>
    %12 = arith.mulf %6, %6 : vector<8x1xf32>
    %13 = arith.subf %11, %12 : vector<8x1xf32>
    %cst_7 = arith.constant 9.99999974E-6 : f32
    %14 = vector.broadcast %cst_7 : f32 to vector<8x1xf32>
    %15 = arith.addf %13, %14 : vector<8x1xf32>
    %16 = math.rsqrt %15 : vector<8x1xf32>
    %17 = vector.broadcast %6 : vector<8x1xf32> to vector<8x128xf32>
    %18 = arith.subf %0, %17 : vector<8x128xf32>
    %19 = arith.mulf %16, %1 : vector<8x1xf32>
    %20 = vector.broadcast %19 : vector<8x1xf32> to vector<8x128xf32>
    %21 = arith.mulf %18, %20 : vector<8x128xf32>
    %22 = vector.broadcast %2 : vector<8x1xf32> to vector<8x128xf32>
    %23 = arith.addf %21, %22 : vector<8x128xf32>
    %24 = arith.mulf %23, %23 : vector<8x128xf32>
    %c0_8 = arith.constant 0 : index
    %c0_9 = arith.constant 0 : index
    %25 = vector.load %arg3[%c0_8, %c0_9] : memref<128x384xf32, #tpu.memory_space<vmem>>, vector<128x384xf32>
    %cst_10 = arith.constant dense<0.000000e+00> : vector<8x384xf32>
    %26 = tpu.matmul %23, %25, %cst_10 {dimension_numbers = #tpu.dot_dimension_numbers<[1], [0], [0], [1], [0, 0, 1, 1], [], []>} : vector<8x128xf32>, vector<128x384xf32>, vector<8x384xf32> -> vector<8x384xf32>
    %c0_11 = arith.constant 0 : index
    %c0_12 = arith.constant 0 : index
    %27 = vector.load %arg4[%c0_11, %c0_12] : memref<128x384xf32, #tpu.memory_space<vmem>>, vector<128x384xf32>
    %cst_13 = arith.constant dense<0.000000e+00> : vector<8x384xf32>
    %28 = tpu.matmul %24, %27, %cst_13 {dimension_numbers = #tpu.dot_dimension_numbers<[1], [0], [0], [1], [0, 0, 1, 1], [], []>} : vector<8x128xf32>, vector<128x384xf32>, vector<8x384xf32> -> vector<8x384xf32>
    %29 = arith.addf %26, %28 : vector<8x384xf32>
    %c0_14 = arith.constant 0 : index
    %c0_15 = arith.constant 0 : index
    %30 = vector.load %arg5[%c0_14, %c0_15] : memref<1x384xf32, #tpu.memory_space<vmem>>, vector<1x384xf32>
    %31 = vector.broadcast %30 : vector<1x384xf32> to vector<8x384xf32>
    %32 = arith.addf %29, %31 : vector<8x384xf32>
    %33 = vector.extract_strided_slice %32 {offsets = [0, 0], sizes = [8, 128], strides = [1, 1]} : vector<8x384xf32> to vector<8x128xf32>
    %34 = vector.extract_strided_slice %32 {offsets = [0, 128], sizes = [8, 128], strides = [1, 1]} : vector<8x384xf32> to vector<8x128xf32>
    %35 = vector.extract_strided_slice %32 {offsets = [0, 256], sizes = [8, 128], strides = [1, 1]} : vector<8x384xf32> to vector<8x128xf32>
    %cst_16 = arith.constant dense<0xFF800000> : vector<8xf32>
    %36 = vector.multi_reduction <maximumf>, %35, %cst_16 [1] : vector<8x128xf32> to vector<8xf32>
    %37 = vector.shape_cast %36 : vector<8xf32> to vector<8x1xf32>
    %38 = vector.broadcast %37 : vector<8x1xf32> to vector<8x128xf32>
    %39 = arith.subf %35, %38 : vector<8x128xf32>
    %40 = math.exp %39 : vector<8x128xf32>
    %cst_17 = arith.constant dense<0.000000e+00> : vector<8xf32>
    %41 = vector.multi_reduction <add>, %40, %cst_17 [1] : vector<8x128xf32> to vector<8xf32>
    %42 = vector.shape_cast %41 : vector<8xf32> to vector<8x1xf32>
    %43 = tpu.reciprocal %42 {approx = true} : vector<8x1xf32> -> vector<8x1xf32>
    %44 = vector.broadcast %43 : vector<8x1xf32> to vector<8x128xf32>
    %45 = arith.mulf %40, %44 : vector<8x128xf32>
    %c0_18 = arith.constant 0 : index
    %c0_19 = arith.constant 0 : index
    %46 = vector.load %arg11[%c0_18, %c0_19] : memref<8x128xf32, #tpu.memory_space<vmem>>, vector<8x128xf32>
    tpu.vector_store %arg11[%c0_18, %c0_19], %23 {strides = array<i32>} : memref<8x128xf32, #tpu.memory_space<vmem>>, vector<8x128xf32>,
    %cst_20 = arith.constant 0.000000e+00 : f32
    %47 = vector.broadcast %cst_20 : f32 to vector<8x256xf32>
    %c0_21 = arith.constant 0 : index
    %c0_22 = arith.constant 0 : index
    %48 = vector.load %arg12[%c0_21, %c0_22] : memref<8x256xf32, #tpu.memory_space<vmem>>, vector<8x256xf32>
    tpu.vector_store %arg12[%c0_21, %c0_22], %47 {strides = array<i32>} : memref<8x256xf32, #tpu.memory_space<vmem>>, vector<8x256xf32>,
    %c0_23 = arith.constant 0 : index
    %c0_24 = arith.constant 0 : index
    %49 = vector.load %arg11[%c0_23, %c0_24] : memref<8x128xf32, #tpu.memory_space<vmem>>, vector<8x1xf32>
    %c0_25 = arith.constant 0 : index
    %c0_26 = arith.constant 0 : index
    %50 = vector.load %arg6[%c0_25, %c0_26] : memref<128x256xf32, #tpu.memory_space<vmem>>, vector<1x256xf32>
    %c0_27 = arith.constant 0 : index
    %c0_28 = arith.constant 0 : index
    %51 = vector.load %arg7[%c0_27, %c0_28] : memref<128x256xf32, #tpu.memory_space<vmem>>, vector<1x256xf32>
    %c0_29 = arith.constant 0 : index
    %c0_30 = arith.constant 0 : index
    %52 = vector.load %arg8[%c0_29, %c0_30] : memref<128x256xf32, #tpu.memory_space<vmem>>, vector<1x256xf32>
    %c0_31 = arith.constant 0 : index
    %c0_32 = arith.constant 0 : index
    %53 = vector.load %arg9[%c0_31, %c0_32] : memref<128x256xf32, #tpu.memory_space<vmem>>, vector<1x256xf32>
    %54 = vector.broadcast %49 : vector<8x1xf32> to vector<8x256xf32>
    %55 = vector.broadcast %50 : vector<1x256xf32> to vector<8x256xf32>
    %56 = arith.subf %54, %55 : vector<8x256xf32>
    %57 = arith.mulf %56, %56 : vector<8x256xf32>
    %58 = vector.broadcast %51 : vector<1x256xf32> to vector<8x256xf32>
    %59 = arith.mulf %57, %58 : vector<8x256xf32>
    %60 = math.exp %59 : vector<8x256xf32>
    %61 = vector.broadcast %52 : vector<1x256xf32> to vector<8x256xf32>
    %62 = arith.mulf %59, %61 : vector<8x256xf32>
    %63 = vector.broadcast %53 : vector<1x256xf32> to vector<8x256xf32>
    %64 = arith.addf %62, %63 : vector<8x256xf32>
    %65 = arith.mulf %60, %64 : vector<8x256xf32>
    %c0_33 = arith.constant 0 : index
    %c0_34 = arith.constant 0 : index
    %66 = vector.load %arg12[%c0_33, %c0_34] : memref<8x256xf32, #tpu.memory_space<vmem>>, vector<8x256xf32>
    %67 = arith.addf %66, %65 : vector<8x256xf32>
    %c0_35 = arith.constant 0 : index
    %c0_36 = arith.constant 0 : index
    %68 = vector.load %arg12[%c0_35, %c0_36] : memref<8x256xf32, #tpu.memory_space<vmem>>, vector<8x256xf32>
    tpu.vector_store %arg12[%c0_35, %c0_36], %67 {strides = array<i32>} : memref<8x256xf32, #tpu.memory_space<vmem>>, vector<8x256xf32>,
    %c0_37 = arith.constant 0 : index
    %c1_38 = arith.constant 1 : index
    %69 = vector.load %arg11[%c0_37, %c1_38] : memref<8x128xf32, #tpu.memory_space<vmem>>, vector<8x1xf32>
    %c1_39 = arith.constant 1 : index
    %c0_40 = arith.constant 0 : index
    %70 = vector.load %arg6[%c1_39, %c0_40] : memref<128x256xf32, #tpu.memory_space<vmem>>, vector<1x256xf32>
    %c1_41 = arith.constant 1 : index
    %c0_42 = arith.constant 0 : index
    %71 = vector.load %arg7[%c1_41, %c0_42] : memref<128x256xf32, #tpu.memory_space<vmem>>, vector<1x256xf32>
    %c1_43 = arith.constant 1 : index
    %c0_44 = arith.constant 0 : index
    %72 = vector.load %arg8[%c1_43, %c0_44] : memref<128x256xf32, #tpu.memory_space<vmem>>, vector<1x256xf32>
    %c1_45 = arith.constant 1 : index
    %c0_46 = arith.constant 0 : index
    %73 = vector.load %arg9[%c1_45, %c0_46] : memref<128x256xf32, #tpu.memory_space<vmem>>, vector<1x256xf32>
    %74 = vector.broadcast %69 : vector<8x1xf32> to vector<8x256xf32>
    %75 = vector.broadcast %70 : vector<1x256xf32> to vector<8x256xf32>
    %76 = arith.subf %74, %75 : vector<8x256xf32>
    %77 = arith.mulf %76, %76 : vector<8x256xf32>
    %78 = vector.broadcast %71 : vector<1x256xf32> to vector<8x256xf32>
    %79 = arith.mulf %77, %78 : vector<8x256xf32>
    %80 = math.exp %79 : vector<8x256xf32>
    %81 = vector.broadcast %72 : vector<1x256xf32> to vector<8x256xf32>
    %82 = arith.mulf %79, %81 : vector<8x256xf32>
    %83 = vector.broadcast %73 : vector<1x256xf32> to vector<8x256xf32>
    %84 = arith.addf %82, %83 : vector<8x256xf32>
    %85 = arith.mulf %80, %84 : vector<8x256xf32>
    %c0_47 = arith.constant 0 : index
    %c0_48 = arith.constant 0 : index
    %86 = vector.load %arg12[%c0_47, %c0_48] : memref<8x256xf32, #tpu.memory_space<vmem>>, vector<8x256xf32>
    %87 = arith.addf %86, %85 : vector<8x256xf32>
    %c0_49 = arith.constant 0 : index
    %c0_50 = arith.constant 0 : index
    %88 = vector.load %arg12[%c0_49, %c0_50] : memref<8x256xf32, #tpu.memory_space<vmem>>, vector<8x256xf32>
    tpu.vector_store %arg12[%c0_49, %c0_50], %87 {strides = array<i32>} : memref<8x256xf32, #tpu.memory_space<vmem>>, vector<8x256xf32>,
    %c0_51 = arith.constant 0 : index
    %c2 = arith.constant 2 : index
    %89 = vector.load %arg11[%c0_51, %c2] : memref<8x128xf32, #tpu.memory_space<vmem>>, vector<8x1xf32>
    %c2_52 = arith.constant 2 : index
    %c0_53 = arith.constant 0 : index
    %90 = vector.load %arg6[%c2_52, %c0_53] : memref<128x256xf32, #tpu.memory_space<vmem>>, vector<1x256xf32>
    %c2_54 = arith.constant 2 : index
    %c0_55 = arith.constant 0 : index
    %91 = vector.load %arg7[%c2_54, %c0_55] : memref<128x256xf32, #tpu.memory_space<vmem>>, vector<1x256xf32>
    %c2_56 = arith.constant 2 : index
    %c0_57 = arith.constant 0 : index
    %92 = vector.load %arg8[%c2_56, %c0_57] : memref<128x256xf32, #tpu.memory_space<vmem>>, vector<1x256xf32>
    %c2_58 = arith.constant 2 : index
    %c0_59 = arith.constant 0 : index
    %93 = vector.load %arg9[%c2_58, %c0_59] : memref<128x256xf32, #tpu.memory_space<vmem>>, vector<1x256xf32>
    %94 = vector.broadcast %89 : vector<8x1xf32> to vector<8x256xf32>
    %95 = vector.broadcast %90 : vector<1x256xf32> to vector<8x256xf32>
    %96 = arith.subf %94, %95 : vector<8x256xf32>
    %97 = arith.mulf %96, %96 : vector<8x256xf32>
    %98 = vector.broadcast %91 : vector<1x256xf32> to vector<8x256xf32>
    %99 = arith.mulf %97, %98 : vector<8x256xf32>
    %100 = math.exp %99 : vector<8x256xf32>
    %101 = vector.broadcast %92 : vector<1x256xf32> to vector<8x256xf32>
    %102 = arith.mulf %99, %101 : vector<8x256xf32>
    %103 = vector.broadcast %93 : vector<1x256xf32> to vector<8x256xf32>
    %104 = arith.addf %102, %103 : vector<8x256xf32>
    %105 = arith.mulf %100, %104 : vector<8x256xf32>
    %c0_60 = arith.constant 0 : index
    %c0_61 = arith.constant 0 : index
    %106 = vector.load %arg12[%c0_60, %c0_61] : memref<8x256xf32, #tpu.memory_space<vmem>>, vector<8x256xf32>
    %107 = arith.addf %106, %105 : vector<8x256xf32>
    %c0_62 = arith.constant 0 : index
    %c0_63 = arith.constant 0 : index
    %108 = vector.load %arg12[%c0_62, %c0_63] : memref<8x256xf32, #tpu.memory_space<vmem>>, vector<8x256xf32>
    tpu.vector_store %arg12[%c0_62, %c0_63], %107 {strides = array<i32>} : memref<8x256xf32, #tpu.memory_space<vmem>>, vector<8x256xf32>,
    %c0_64 = arith.constant 0 : index
    %c3 = arith.constant 3 : index
    %109 = vector.load %arg11[%c0_64, %c3] : memref<8x128xf32, #tpu.memory_space<vmem>>, vector<8x1xf32>
    %c3_65 = arith.constant 3 : index
    %c0_66 = arith.constant 0 : index
    %110 = vector.load %arg6[%c3_65, %c0_66] : memref<128x256xf32, #tpu.memory_space<vmem>>, vector<1x256xf32>
    %c3_67 = arith.constant 3 : index
    %c0_68 = arith.constant 0 : index
    %111 = vector.load %arg7[%c3_67, %c0_68] : memref<128x256xf32, #tpu.memory_space<vmem>>, vector<1x256xf32>
    %c3_69 = arith.constant 3 : index
    %c0_70 = arith.constant 0 : index
    %112 = vector.load %arg8[%c3_69, %c0_70] : memref<128x256xf32, #tpu.memory_space<vmem>>, vector<1x256xf32>
    %c3_71 = arith.constant 3 : index
    %c0_72 = arith.constant 0 : index
    %113 = vector.load %arg9[%c3_71, %c0_72] : memref<128x256xf32, #tpu.memory_space<vmem>>, vector<1x256xf32>
    %114 = vector.broadcast %109 : vector<8x1xf32> to vector<8x256xf32>
    %115 = vector.broadcast %110 : vector<1x256xf32> to vector<8x256xf32>
    %116 = arith.subf %114, %115 : vector<8x256xf32>
    %117 = arith.mulf %116, %116 : vector<8x256xf32>
    %118 = vector.broadcast %111 : vector<1x256xf32> to vector<8x256xf32>
    %119 = arith.mulf %117, %118 : vector<8x256xf32>
    %120 = math.exp %119 : vector<8x256xf32>
    %121 = vector.broadcast %112 : vector<1x256xf32> to vector<8x256xf32>
    %122 = arith.mulf %119, %121 : vector<8x256xf32>
    %123 = vector.broadcast %113 : vector<1x256xf32> to vector<8x256xf32>
    %124 = arith.addf %122, %123 : vector<8x256xf32>
    %125 = arith.mulf %120, %124 : vector<8x256xf32>
    %c0_73 = arith.constant 0 : index
    %c0_74 = arith.constant 0 : index
    %126 = vector.load %arg12[%c0_73, %c0_74] : memref<8x256xf32, #tpu.memory_space<vmem>>, vector<8x256xf32>
    %127 = arith.addf %126, %125 : vector<8x256xf32>
    %c0_75 = arith.constant 0 : index
    %c0_76 = arith.constant 0 : index
    %128 = vector.load %arg12[%c0_75, %c0_76] : memref<8x256xf32, #tpu.memory_space<vmem>>, vector<8x256xf32>
    tpu.vector_store %arg12[%c0_75, %c0_76], %127 {strides = array<i32>} : memref<8x256xf32, #tpu.memory_space<vmem>>, vector<8x256xf32>,
    %c0_77 = arith.constant 0 : index
    %c4 = arith.constant 4 : index
    %129 = vector.load %arg11[%c0_77, %c4] : memref<8x128xf32, #tpu.memory_space<vmem>>, vector<8x1xf32>
    %c4_78 = arith.constant 4 : index
    %c0_79 = arith.constant 0 : index
    %130 = vector.load %arg6[%c4_78, %c0_79] : memref<128x256xf32, #tpu.memory_space<vmem>>, vector<1x256xf32>
    %c4_80 = arith.constant 4 : index
    %c0_81 = arith.constant 0 : index
    %131 = vector.load %arg7[%c4_80, %c0_81] : memref<128x256xf32, #tpu.memory_space<vmem>>, vector<1x256xf32>
    %c4_82 = arith.constant 4 : index
    %c0_83 = arith.constant 0 : index
    %132 = vector.load %arg8[%c4_82, %c0_83] : memref<128x256xf32, #tpu.memory_space<vmem>>, vector<1x256xf32>
    %c4_84 = arith.constant 4 : index
    %c0_85 = arith.constant 0 : index
    %133 = vector.load %arg9[%c4_84, %c0_85] : memref<128x256xf32, #tpu.memory_space<vmem>>, vector<1x256xf32>
    %134 = vector.broadcast %129 : vector<8x1xf32> to vector<8x256xf32>
    %135 = vector.broadcast %130 : vector<1x256xf32> to vector<8x256xf32>
    %136 = arith.subf %134, %135 : vector<8x256xf32>
    %137 = arith.mulf %136, %136 : vector<8x256xf32>
    %138 = vector.broadcast %131 : vector<1x256xf32> to vector<8x256xf32>
    %139 = arith.mulf %137, %138 : vector<8x256xf32>
    %140 = math.exp %139 : vector<8x256xf32>
    %141 = vector.broadcast %132 : vector<1x256xf32> to vector<8x256xf32>
    %142 = arith.mulf %139, %141 : vector<8x256xf32>
    %143 = vector.broadcast %133 : vector<1x256xf32> to vector<8x256xf32>
    %144 = arith.addf %142, %143 : vector<8x256xf32>
    %145 = arith.mulf %140, %144 : vector<8x256xf32>
    %c0_86 = arith.constant 0 : index
    %c0_87 = arith.constant 0 : index
    %146 = vector.load %arg12[%c0_86, %c0_87] : memref<8x256xf32, #tpu.memory_space<vmem>>, vector<8x256xf32>
    %147 = arith.addf %146, %145 : vector<8x256xf32>
    %c0_88 = arith.constant 0 : index
    %c0_89 = arith.constant 0 : index
    %148 = vector.load %arg12[%c0_88, %c0_89] : memref<8x256xf32, #tpu.memory_space<vmem>>, vector<8x256xf32>
    tpu.vector_store %arg12[%c0_88, %c0_89], %147 {strides = array<i32>} : memref<8x256xf32, #tpu.memory_space<vmem>>, vector<8x256xf32>,
    %c0_90 = arith.constant 0 : index
    %c5 = arith.constant 5 : index
    %149 = vector.load %arg11[%c0_90, %c5] : memref<8x128xf32, #tpu.memory_space<vmem>>, vector<8x1xf32>
    %c5_91 = arith.constant 5 : index
    %c0_92 = arith.constant 0 : index
    %150 = vector.load %arg6[%c5_91, %c0_92] : memref<128x256xf32, #tpu.memory_space<vmem>>, vector<1x256xf32>
    %c5_93 = arith.constant 5 : index
    %c0_94 = arith.constant 0 : index
    %151 = vector.load %arg7[%c5_93, %c0_94] : memref<128x256xf32, #tpu.memory_space<vmem>>, vector<1x256xf32>
    %c5_95 = arith.constant 5 : index
    %c0_96 = arith.constant 0 : index
    %152 = vector.load %arg8[%c5_95, %c0_96] : memref<128x256xf32, #tpu.memory_space<vmem>>, vector<1x256xf32>
    %c5_97 = arith.constant 5 : index
    %c0_98 = arith.constant 0 : index
    %153 = vector.load %arg9[%c5_97, %c0_98] : memref<128x256xf32, #tpu.memory_space<vmem>>, vector<1x256xf32>
    %154 = vector.broadcast %149 : vector<8x1xf32> to vector<8x256xf32>
    %155 = vector.broadcast %150 : vector<1x256xf32> to vector<8x256xf32>
    %156 = arith.subf %154, %155 : vector<8x256xf32>
    %157 = arith.mulf %156, %156 : vector<8x256xf32>
    %158 = vector.broadcast %151 : vector<1x256xf32> to vector<8x256xf32>
    %159 = arith.mulf %157, %158 : vector<8x256xf32>
    %160 = math.exp %159 : vector<8x256xf32>
    %161 = vector.broadcast %152 : vector<1x256xf32> to vector<8x256xf32>
    %162 = arith.mulf %159, %161 : vector<8x256xf32>
    %163 = vector.broadcast %153 : vector<1x256xf32> to vector<8x256xf32>
    %164 = arith.addf %162, %163 : vector<8x256xf32>
    %165 = arith.mulf %160, %164 : vector<8x256xf32>
    %c0_99 = arith.constant 0 : index
    %c0_100 = arith.constant 0 : index
    %166 = vector.load %arg12[%c0_99, %c0_100] : memref<8x256xf32, #tpu.memory_space<vmem>>, vector<8x256xf32>
    %167 = arith.addf %166, %165 : vector<8x256xf32>
    %c0_101 = arith.constant 0 : index
    %c0_102 = arith.constant 0 : index
    %168 = vector.load %arg12[%c0_101, %c0_102] : memref<8x256xf32, #tpu.memory_space<vmem>>, vector<8x256xf32>
    tpu.vector_store %arg12[%c0_101, %c0_102], %167 {strides = array<i32>} : memref<8x256xf32, #tpu.memory_space<vmem>>, vector<8x256xf32>,
    %c0_103 = arith.constant 0 : index
    %c6 = arith.constant 6 : index
    %169 = vector.load %arg11[%c0_103, %c6] : memref<8x128xf32, #tpu.memory_space<vmem>>, vector<8x1xf32>
    %c6_104 = arith.constant 6 : index
    %c0_105 = arith.constant 0 : index
    %170 = vector.load %arg6[%c6_104, %c0_105] : memref<128x256xf32, #tpu.memory_space<vmem>>, vector<1x256xf32>
    %c6_106 = arith.constant 6 : index
    %c0_107 = arith.constant 0 : index
    %171 = vector.load %arg7[%c6_106, %c0_107] : memref<128x256xf32, #tpu.memory_space<vmem>>, vector<1x256xf32>
    %c6_108 = arith.constant 6 : index
    %c0_109 = arith.constant 0 : index
    %172 = vector.load %arg8[%c6_108, %c0_109] : memref<128x256xf32, #tpu.memory_space<vmem>>, vector<1x256xf32>
    %c6_110 = arith.constant 6 : index
    %c0_111 = arith.constant 0 : index
    %173 = vector.load %arg9[%c6_110, %c0_111] : memref<128x256xf32, #tpu.memory_space<vmem>>, vector<1x256xf32>
    %174 = vector.broadcast %169 : vector<8x1xf32> to vector<8x256xf32>
    %175 = vector.broadcast %170 : vector<1x256xf32> to vector<8x256xf32>
    %176 = arith.subf %174, %175 : vector<8x256xf32>
    %177 = arith.mulf %176, %176 : vector<8x256xf32>
    %178 = vector.broadcast %171 : vector<1x256xf32> to vector<8x256xf32>
    %179 = arith.mulf %177, %178 : vector<8x256xf32>
    %180 = math.exp %179 : vector<8x256xf32>
    %181 = vector.broadcast %172 : vector<1x256xf32> to vector<8x256xf32>
    %182 = arith.mulf %179, %181 : vector<8x256xf32>
    %183 = vector.broadcast %173 : vector<1x256xf32> to vector<8x256xf32>
    %184 = arith.addf %182, %183 : vector<8x256xf32>
    %185 = arith.mulf %180, %184 : vector<8x256xf32>
    %c0_112 = arith.constant 0 : index
    %c0_113 = arith.constant 0 : index
    %186 = vector.load %arg12[%c0_112, %c0_113] : memref<8x256xf32, #tpu.memory_space<vmem>>, vector<8x256xf32>
    %187 = arith.addf %186, %185 : vector<8x256xf32>
    %c0_114 = arith.constant 0 : index
    %c0_115 = arith.constant 0 : index
    %188 = vector.load %arg12[%c0_114, %c0_115] : memref<8x256xf32, #tpu.memory_space<vmem>>, vector<8x256xf32>
    tpu.vector_store %arg12[%c0_114, %c0_115], %187 {strides = array<i32>} : memref<8x256xf32, #tpu.memory_space<vmem>>, vector<8x256xf32>,
    %c0_116 = arith.constant 0 : index
    %c7 = arith.constant 7 : index
    %189 = vector.load %arg11[%c0_116, %c7] : memref<8x128xf32, #tpu.memory_space<vmem>>, vector<8x1xf32>
    %c7_117 = arith.constant 7 : index
    %c0_118 = arith.constant 0 : index
    %190 = vector.load %arg6[%c7_117, %c0_118] : memref<128x256xf32, #tpu.memory_space<vmem>>, vector<1x256xf32>
    %c7_119 = arith.constant 7 : index
    %c0_120 = arith.constant 0 : index
    %191 = vector.load %arg7[%c7_119, %c0_120] : memref<128x256xf32, #tpu.memory_space<vmem>>, vector<1x256xf32>
    %c7_121 = arith.constant 7 : index
    %c0_122 = arith.constant 0 : index
    %192 = vector.load %arg8[%c7_121, %c0_122] : memref<128x256xf32, #tpu.memory_space<vmem>>, vector<1x256xf32>
    %c7_123 = arith.constant 7 : index
    %c0_124 = arith.constant 0 : index
    %193 = vector.load %arg9[%c7_123, %c0_124] : memref<128x256xf32, #tpu.memory_space<vmem>>, vector<1x256xf32>
    %194 = vector.broadcast %189 : vector<8x1xf32> to vector<8x256xf32>
    %195 = vector.broadcast %190 : vector<1x256xf32> to vector<8x256xf32>
    %196 = arith.subf %194, %195 : vector<8x256xf32>
    %197 = arith.mulf %196, %196 : vector<8x256xf32>
    %198 = vector.broadcast %191 : vector<1x256xf32> to vector<8x256xf32>
    %199 = arith.mulf %197, %198 : vector<8x256xf32>
    %200 = math.exp %199 : vector<8x256xf32>
    %201 = vector.broadcast %192 : vector<1x256xf32> to vector<8x256xf32>
    %202 = arith.mulf %199, %201 : vector<8x256xf32>
    %203 = vector.broadcast %193 : vector<1x256xf32> to vector<8x256xf32>
    %204 = arith.addf %202, %203 : vector<8x256xf32>
    %205 = arith.mulf %200, %204 : vector<8x256xf32>
    %c0_125 = arith.constant 0 : index
    %c0_126 = arith.constant 0 : index
    %206 = vector.load %arg12[%c0_125, %c0_126] : memref<8x256xf32, #tpu.memory_space<vmem>>, vector<8x256xf32>
    %207 = arith.addf %206, %205 : vector<8x256xf32>
    %c0_127 = arith.constant 0 : index
    %c0_128 = arith.constant 0 : index
    %208 = vector.load %arg12[%c0_127, %c0_128] : memref<8x256xf32, #tpu.memory_space<vmem>>, vector<8x256xf32>
    tpu.vector_store %arg12[%c0_127, %c0_128], %207 {strides = array<i32>} : memref<8x256xf32, #tpu.memory_space<vmem>>, vector<8x256xf32>,
    %c0_129 = arith.constant 0 : index
    %c8 = arith.constant 8 : index
    %209 = vector.load %arg11[%c0_129, %c8] : memref<8x128xf32, #tpu.memory_space<vmem>>, vector<8x1xf32>
    %c8_130 = arith.constant 8 : index
    %c0_131 = arith.constant 0 : index
    %210 = vector.load %arg6[%c8_130, %c0_131] : memref<128x256xf32, #tpu.memory_space<vmem>>, vector<1x256xf32>
    %c8_132 = arith.constant 8 : index
    %c0_133 = arith.constant 0 : index
    %211 = vector.load %arg7[%c8_132, %c0_133] : memref<128x256xf32, #tpu.memory_space<vmem>>, vector<1x256xf32>
    %c8_134 = arith.constant 8 : index
    %c0_135 = arith.constant 0 : index
    %212 = vector.load %arg8[%c8_134, %c0_135] : memref<128x256xf32, #tpu.memory_space<vmem>>, vector<1x256xf32>
    %c8_136 = arith.constant 8 : index
    %c0_137 = arith.constant 0 : index
    %213 = vector.load %arg9[%c8_136, %c0_137] : memref<128x256xf32, #tpu.memory_space<vmem>>, vector<1x256xf32>
    %214 = vector.broadcast %209 : vector<8x1xf32> to vector<8x256xf32>
    %215 = vector.broadcast %210 : vector<1x256xf32> to vector<8x256xf32>
    %216 = arith.subf %214, %215 : vector<8x256xf32>
    %217 = arith.mulf %216, %216 : vector<8x256xf32>
    %218 = vector.broadcast %211 : vector<1x256xf32> to vector<8x256xf32>
    %219 = arith.mulf %217, %218 : vector<8x256xf32>
    %220 = math.exp %219 : vector<8x256xf32>
    %221 = vector.broadcast %212 : vector<1x256xf32> to vector<8x256xf32>
    %222 = arith.mulf %219, %221 : vector<8x256xf32>
    %223 = vector.broadcast %213 : vector<1x256xf32> to vector<8x256xf32>
    %224 = arith.addf %222, %223 : vector<8x256xf32>
    %225 = arith.mulf %220, %224 : vector<8x256xf32>
    %c0_138 = arith.constant 0 : index
    %c0_139 = arith.constant 0 : index
    %226 = vector.load %arg12[%c0_138, %c0_139] : memref<8x256xf32, #tpu.memory_space<vmem>>, vector<8x256xf32>
    %227 = arith.addf %226, %225 : vector<8x256xf32>
    %c0_140 = arith.constant 0 : index
    %c0_141 = arith.constant 0 : index
    %228 = vector.load %arg12[%c0_140, %c0_141] : memref<8x256xf32, #tpu.memory_space<vmem>>, vector<8x256xf32>
    tpu.vector_store %arg12[%c0_140, %c0_141], %227 {strides = array<i32>} : memref<8x256xf32, #tpu.memory_space<vmem>>, vector<8x256xf32>,
    %c0_142 = arith.constant 0 : index
    %c9 = arith.constant 9 : index
    %229 = vector.load %arg11[%c0_142, %c9] : memref<8x128xf32, #tpu.memory_space<vmem>>, vector<8x1xf32>
    %c9_143 = arith.constant 9 : index
    %c0_144 = arith.constant 0 : index
    %230 = vector.load %arg6[%c9_143, %c0_144] : memref<128x256xf32, #tpu.memory_space<vmem>>, vector<1x256xf32>
    %c9_145 = arith.constant 9 : index
    %c0_146 = arith.constant 0 : index
    %231 = vector.load %arg7[%c9_145, %c0_146] : memref<128x256xf32, #tpu.memory_space<vmem>>, vector<1x256xf32>
    %c9_147 = arith.constant 9 : index
    %c0_148 = arith.constant 0 : index
    %232 = vector.load %arg8[%c9_147, %c0_148] : memref<128x256xf32, #tpu.memory_space<vmem>>, vector<1x256xf32>
    %c9_149 = arith.constant 9 : index
    %c0_150 = arith.constant 0 : index
    %233 = vector.load %arg9[%c9_149, %c0_150] : memref<128x256xf32, #tpu.memory_space<vmem>>, vector<1x256xf32>
    %234 = vector.broadcast %229 : vector<8x1xf32> to vector<8x256xf32>
    %235 = vector.broadcast %230 : vector<1x256xf32> to vector<8x256xf32>
    %236 = arith.subf %234, %235 : vector<8x256xf32>
    %237 = arith.mulf %236, %236 : vector<8x256xf32>
    %238 = vector.broadcast %231 : vector<1x256xf32> to vector<8x256xf32>
    %239 = arith.mulf %237, %238 : vector<8x256xf32>
    %240 = math.exp %239 : vector<8x256xf32>
    %241 = vector.broadcast %232 : vector<1x256xf32> to vector<8x256xf32>
    %242 = arith.mulf %239, %241 : vector<8x256xf32>
    %243 = vector.broadcast %233 : vector<1x256xf32> to vector<8x256xf32>
    %244 = arith.addf %242, %243 : vector<8x256xf32>
    %245 = arith.mulf %240, %244 : vector<8x256xf32>
    %c0_151 = arith.constant 0 : index
    %c0_152 = arith.constant 0 : index
    %246 = vector.load %arg12[%c0_151, %c0_152] : memref<8x256xf32, #tpu.memory_space<vmem>>, vector<8x256xf32>
    %247 = arith.addf %246, %245 : vector<8x256xf32>
    %c0_153 = arith.constant 0 : index
    %c0_154 = arith.constant 0 : index
    %248 = vector.load %arg12[%c0_153, %c0_154] : memref<8x256xf32, #tpu.memory_space<vmem>>, vector<8x256xf32>
    tpu.vector_store %arg12[%c0_153, %c0_154], %247 {strides = array<i32>} : memref<8x256xf32, #tpu.memory_space<vmem>>, vector<8x256xf32>,
    %c0_155 = arith.constant 0 : index
    %c10 = arith.constant 10 : index
    %249 = vector.load %arg11[%c0_155, %c10] : memref<8x128xf32, #tpu.memory_space<vmem>>, vector<8x1xf32>
    %c10_156 = arith.constant 10 : index
    %c0_157 = arith.constant 0 : index
    %250 = vector.load %arg6[%c10_156, %c0_157] : memref<128x256xf32, #tpu.memory_space<vmem>>, vector<1x256xf32>
    %c10_158 = arith.constant 10 : index
    %c0_159 = arith.constant 0 : index
    %251 = vector.load %arg7[%c10_158, %c0_159] : memref<128x256xf32, #tpu.memory_space<vmem>>, vector<1x256xf32>
    %c10_160 = arith.constant 10 : index
    %c0_161 = arith.constant 0 : index
    %252 = vector.load %arg8[%c10_160, %c0_161] : memref<128x256xf32, #tpu.memory_space<vmem>>, vector<1x256xf32>
    %c10_162 = arith.constant 10 : index
    %c0_163 = arith.constant 0 : index
    %253 = vector.load %arg9[%c10_162, %c0_163] : memref<128x256xf32, #tpu.memory_space<vmem>>, vector<1x256xf32>
    %254 = vector.broadcast %249 : vector<8x1xf32> to vector<8x256xf32>
    %255 = vector.broadcast %250 : vector<1x256xf32> to vector<8x256xf32>
    %256 = arith.subf %254, %255 : vector<8x256xf32>
    %257 = arith.mulf %256, %256 : vector<8x256xf32>
    %258 = vector.broadcast %251 : vector<1x256xf32> to vector<8x256xf32>
    %259 = arith.mulf %257, %258 : vector<8x256xf32>
    %260 = math.exp %259 : vector<8x256xf32>
    %261 = vector.broadcast %252 : vector<1x256xf32> to vector<8x256xf32>
    %262 = arith.mulf %259, %261 : vector<8x256xf32>
    %263 = vector.broadcast %253 : vector<1x256xf32> to vector<8x256xf32>
    %264 = arith.addf %262, %263 : vector<8x256xf32>
    %265 = arith.mulf %260, %264 : vector<8x256xf32>
    %c0_164 = arith.constant 0 : index
    %c0_165 = arith.constant 0 : index
    %266 = vector.load %arg12[%c0_164, %c0_165] : memref<8x256xf32, #tpu.memory_space<vmem>>, vector<8x256xf32>
    %267 = arith.addf %266, %265 : vector<8x256xf32>
    %c0_166 = arith.constant 0 : index
    %c0_167 = arith.constant 0 : index
    %268 = vector.load %arg12[%c0_166, %c0_167] : memref<8x256xf32, #tpu.memory_space<vmem>>, vector<8x256xf32>
    tpu.vector_store %arg12[%c0_166, %c0_167], %267 {strides = array<i32>} : memref<8x256xf32, #tpu.memory_space<vmem>>, vector<8x256xf32>,
    %c0_168 = arith.constant 0 : index
    %c11 = arith.constant 11 : index
    %269 = vector.load %arg11[%c0_168, %c11] : memref<8x128xf32, #tpu.memory_space<vmem>>, vector<8x1xf32>
    %c11_169 = arith.constant 11 : index
    %c0_170 = arith.constant 0 : index
    %270 = vector.load %arg6[%c11_169, %c0_170] : memref<128x256xf32, #tpu.memory_space<vmem>>, vector<1x256xf32>
    %c11_171 = arith.constant 11 : index
    %c0_172 = arith.constant 0 : index
    %271 = vector.load %arg7[%c11_171, %c0_172] : memref<128x256xf32, #tpu.memory_space<vmem>>, vector<1x256xf32>
    %c11_173 = arith.constant 11 : index
    %c0_174 = arith.constant 0 : index
    %272 = vector.load %arg8[%c11_173, %c0_174] : memref<128x256xf32, #tpu.memory_space<vmem>>, vector<1x256xf32>
    %c11_175 = arith.constant 11 : index
    %c0_176 = arith.constant 0 : index
    %273 = vector.load %arg9[%c11_175, %c0_176] : memref<128x256xf32, #tpu.memory_space<vmem>>, vector<1x256xf32>
    %274 = vector.broadcast %269 : vector<8x1xf32> to vector<8x256xf32>
    %275 = vector.broadcast %270 : vector<1x256xf32> to vector<8x256xf32>
    %276 = arith.subf %274, %275 : vector<8x256xf32>
    %277 = arith.mulf %276, %276 : vector<8x256xf32>
    %278 = vector.broadcast %271 : vector<1x256xf32> to vector<8x256xf32>
    %279 = arith.mulf %277, %278 : vector<8x256xf32>
    %280 = math.exp %279 : vector<8x256xf32>
    %281 = vector.broadcast %272 : vector<1x256xf32> to vector<8x256xf32>
    %282 = arith.mulf %279, %281 : vector<8x256xf32>
    %283 = vector.broadcast %273 : vector<1x256xf32> to vector<8x256xf32>
    %284 = arith.addf %282, %283 : vector<8x256xf32>
    %285 = arith.mulf %280, %284 : vector<8x256xf32>
    %c0_177 = arith.constant 0 : index
    %c0_178 = arith.constant 0 : index
    %286 = vector.load %arg12[%c0_177, %c0_178] : memref<8x256xf32, #tpu.memory_space<vmem>>, vector<8x256xf32>
    %287 = arith.addf %286, %285 : vector<8x256xf32>
    %c0_179 = arith.constant 0 : index
    %c0_180 = arith.constant 0 : index
    %288 = vector.load %arg12[%c0_179, %c0_180] : memref<8x256xf32, #tpu.memory_space<vmem>>, vector<8x256xf32>
    tpu.vector_store %arg12[%c0_179, %c0_180], %287 {strides = array<i32>} : memref<8x256xf32, #tpu.memory_space<vmem>>, vector<8x256xf32>,
    %c0_181 = arith.constant 0 : index
    %c12 = arith.constant 12 : index
    %289 = vector.load %arg11[%c0_181, %c12] : memref<8x128xf32, #tpu.memory_space<vmem>>, vector<8x1xf32>
    %c12_182 = arith.constant 12 : index
    %c0_183 = arith.constant 0 : index
    %290 = vector.load %arg6[%c12_182, %c0_183] : memref<128x256xf32, #tpu.memory_space<vmem>>, vector<1x256xf32>
    %c12_184 = arith.constant 12 : index
    %c0_185 = arith.constant 0 : index
    %291 = vector.load %arg7[%c12_184, %c0_185] : memref<128x256xf32, #tpu.memory_space<vmem>>, vector<1x256xf32>
    %c12_186 = arith.constant 12 : index
    %c0_187 = arith.constant 0 : index
    %292 = vector.load %arg8[%c12_186, %c0_187] : memref<128x256xf32, #tpu.memory_space<vmem>>, vector<1x256xf32>
    %c12_188 = arith.constant 12 : index
    %c0_189 = arith.constant 0 : index
    %293 = vector.load %arg9[%c12_188, %c0_189] : memref<128x256xf32, #tpu.memory_space<vmem>>, vector<1x256xf32>
    %294 = vector.broadcast %289 : vector<8x1xf32> to vector<8x256xf32>
    %295 = vector.broadcast %290 : vector<1x256xf32> to vector<8x256xf32>
    %296 = arith.subf %294, %295 : vector<8x256xf32>
    %297 = arith.mulf %296, %296 : vector<8x256xf32>
    %298 = vector.broadcast %291 : vector<1x256xf32> to vector<8x256xf32>
    %299 = arith.mulf %297, %298 : vector<8x256xf32>
    %300 = math.exp %299 : vector<8x256xf32>
    %301 = vector.broadcast %292 : vector<1x256xf32> to vector<8x256xf32>
    %302 = arith.mulf %299, %301 : vector<8x256xf32>
    %303 = vector.broadcast %293 : vector<1x256xf32> to vector<8x256xf32>
    %304 = arith.addf %302, %303 : vector<8x256xf32>
    %305 = arith.mulf %300, %304 : vector<8x256xf32>
    %c0_190 = arith.constant 0 : index
    %c0_191 = arith.constant 0 : index
    %306 = vector.load %arg12[%c0_190, %c0_191] : memref<8x256xf32, #tpu.memory_space<vmem>>, vector<8x256xf32>
    %307 = arith.addf %306, %305 : vector<8x256xf32>
    %c0_192 = arith.constant 0 : index
    %c0_193 = arith.constant 0 : index
    %308 = vector.load %arg12[%c0_192, %c0_193] : memref<8x256xf32, #tpu.memory_space<vmem>>, vector<8x256xf32>
    tpu.vector_store %arg12[%c0_192, %c0_193], %307 {strides = array<i32>} : memref<8x256xf32, #tpu.memory_space<vmem>>, vector<8x256xf32>,
    %c0_194 = arith.constant 0 : index
    %c13 = arith.constant 13 : index
    %309 = vector.load %arg11[%c0_194, %c13] : memref<8x128xf32, #tpu.memory_space<vmem>>, vector<8x1xf32>
    %c13_195 = arith.constant 13 : index
    %c0_196 = arith.constant 0 : index
    %310 = vector.load %arg6[%c13_195, %c0_196] : memref<128x256xf32, #tpu.memory_space<vmem>>, vector<1x256xf32>
    %c13_197 = arith.constant 13 : index
    %c0_198 = arith.constant 0 : index
    %311 = vector.load %arg7[%c13_197, %c0_198] : memref<128x256xf32, #tpu.memory_space<vmem>>, vector<1x256xf32>
    %c13_199 = arith.constant 13 : index
    %c0_200 = arith.constant 0 : index
    %312 = vector.load %arg8[%c13_199, %c0_200] : memref<128x256xf32, #tpu.memory_space<vmem>>, vector<1x256xf32>
    %c13_201 = arith.constant 13 : index
    %c0_202 = arith.constant 0 : index
    %313 = vector.load %arg9[%c13_201, %c0_202] : memref<128x256xf32, #tpu.memory_space<vmem>>, vector<1x256xf32>
    %314 = vector.broadcast %309 : vector<8x1xf32> to vector<8x256xf32>
    %315 = vector.broadcast %310 : vector<1x256xf32> to vector<8x256xf32>
    %316 = arith.subf %314, %315 : vector<8x256xf32>
    %317 = arith.mulf %316, %316 : vector<8x256xf32>
    %318 = vector.broadcast %311 : vector<1x256xf32> to vector<8x256xf32>
    %319 = arith.mulf %317, %318 : vector<8x256xf32>
    %320 = math.exp %319 : vector<8x256xf32>
    %321 = vector.broadcast %312 : vector<1x256xf32> to vector<8x256xf32>
    %322 = arith.mulf %319, %321 : vector<8x256xf32>
    %323 = vector.broadcast %313 : vector<1x256xf32> to vector<8x256xf32>
    %324 = arith.addf %322, %323 : vector<8x256xf32>
    %325 = arith.mulf %320, %324 : vector<8x256xf32>
    %c0_203 = arith.constant 0 : index
    %c0_204 = arith.constant 0 : index
    %326 = vector.load %arg12[%c0_203, %c0_204] : memref<8x256xf32, #tpu.memory_space<vmem>>, vector<8x256xf32>
    %327 = arith.addf %326, %325 : vector<8x256xf32>
    %c0_205 = arith.constant 0 : index
    %c0_206 = arith.constant 0 : index
    %328 = vector.load %arg12[%c0_205, %c0_206] : memref<8x256xf32, #tpu.memory_space<vmem>>, vector<8x256xf32>
    tpu.vector_store %arg12[%c0_205, %c0_206], %327 {strides = array<i32>} : memref<8x256xf32, #tpu.memory_space<vmem>>, vector<8x256xf32>,
    %c0_207 = arith.constant 0 : index
    %c14 = arith.constant 14 : index
    %329 = vector.load %arg11[%c0_207, %c14] : memref<8x128xf32, #tpu.memory_space<vmem>>, vector<8x1xf32>
    %c14_208 = arith.constant 14 : index
    %c0_209 = arith.constant 0 : index
    %330 = vector.load %arg6[%c14_208, %c0_209] : memref<128x256xf32, #tpu.memory_space<vmem>>, vector<1x256xf32>
    %c14_210 = arith.constant 14 : index
    %c0_211 = arith.constant 0 : index
    %331 = vector.load %arg7[%c14_210, %c0_211] : memref<128x256xf32, #tpu.memory_space<vmem>>, vector<1x256xf32>
    %c14_212 = arith.constant 14 : index
    %c0_213 = arith.constant 0 : index
    %332 = vector.load %arg8[%c14_212, %c0_213] : memref<128x256xf32, #tpu.memory_space<vmem>>, vector<1x256xf32>
    %c14_214 = arith.constant 14 : index
    %c0_215 = arith.constant 0 : index
    %333 = vector.load %arg9[%c14_214, %c0_215] : memref<128x256xf32, #tpu.memory_space<vmem>>, vector<1x256xf32>
    %334 = vector.broadcast %329 : vector<8x1xf32> to vector<8x256xf32>
    %335 = vector.broadcast %330 : vector<1x256xf32> to vector<8x256xf32>
    %336 = arith.subf %334, %335 : vector<8x256xf32>
    %337 = arith.mulf %336, %336 : vector<8x256xf32>
    %338 = vector.broadcast %331 : vector<1x256xf32> to vector<8x256xf32>
    %339 = arith.mulf %337, %338 : vector<8x256xf32>
    %340 = math.exp %339 : vector<8x256xf32>
    %341 = vector.broadcast %332 : vector<1x256xf32> to vector<8x256xf32>
    %342 = arith.mulf %339, %341 : vector<8x256xf32>
    %343 = vector.broadcast %333 : vector<1x256xf32> to vector<8x256xf32>
    %344 = arith.addf %342, %343 : vector<8x256xf32>
    %345 = arith.mulf %340, %344 : vector<8x256xf32>
    %c0_216 = arith.constant 0 : index
    %c0_217 = arith.constant 0 : index
    %346 = vector.load %arg12[%c0_216, %c0_217] : memref<8x256xf32, #tpu.memory_space<vmem>>, vector<8x256xf32>
    %347 = arith.addf %346, %345 : vector<8x256xf32>
    %c0_218 = arith.constant 0 : index
    %c0_219 = arith.constant 0 : index
    %348 = vector.load %arg12[%c0_218, %c0_219] : memref<8x256xf32, #tpu.memory_space<vmem>>, vector<8x256xf32>
    tpu.vector_store %arg12[%c0_218, %c0_219], %347 {strides = array<i32>} : memref<8x256xf32, #tpu.memory_space<vmem>>, vector<8x256xf32>,
    %c0_220 = arith.constant 0 : index
    %c15 = arith.constant 15 : index
    %349 = vector.load %arg11[%c0_220, %c15] : memref<8x128xf32, #tpu.memory_space<vmem>>, vector<8x1xf32>
    %c15_221 = arith.constant 15 : index
    %c0_222 = arith.constant 0 : index
    %350 = vector.load %arg6[%c15_221, %c0_222] : memref<128x256xf32, #tpu.memory_space<vmem>>, vector<1x256xf32>
    %c15_223 = arith.constant 15 : index
    %c0_224 = arith.constant 0 : index
    %351 = vector.load %arg7[%c15_223, %c0_224] : memref<128x256xf32, #tpu.memory_space<vmem>>, vector<1x256xf32>
    %c15_225 = arith.constant 15 : index
    %c0_226 = arith.constant 0 : index
    %352 = vector.load %arg8[%c15_225, %c0_226] : memref<128x256xf32, #tpu.memory_space<vmem>>, vector<1x256xf32>
    %c15_227 = arith.constant 15 : index
    %c0_228 = arith.constant 0 : index
    %353 = vector.load %arg9[%c15_227, %c0_228] : memref<128x256xf32, #tpu.memory_space<vmem>>, vector<1x256xf32>
    %354 = vector.broadcast %349 : vector<8x1xf32> to vector<8x256xf32>
    %355 = vector.broadcast %350 : vector<1x256xf32> to vector<8x256xf32>
    %356 = arith.subf %354, %355 : vector<8x256xf32>
    %357 = arith.mulf %356, %356 : vector<8x256xf32>
    %358 = vector.broadcast %351 : vector<1x256xf32> to vector<8x256xf32>
    %359 = arith.mulf %357, %358 : vector<8x256xf32>
    %360 = math.exp %359 : vector<8x256xf32>
    %361 = vector.broadcast %352 : vector<1x256xf32> to vector<8x256xf32>
    %362 = arith.mulf %359, %361 : vector<8x256xf32>
    %363 = vector.broadcast %353 : vector<1x256xf32> to vector<8x256xf32>
    %364 = arith.addf %362, %363 : vector<8x256xf32>
    %365 = arith.mulf %360, %364 : vector<8x256xf32>
    %c0_229 = arith.constant 0 : index
    %c0_230 = arith.constant 0 : index
    %366 = vector.load %arg12[%c0_229, %c0_230] : memref<8x256xf32, #tpu.memory_space<vmem>>, vector<8x256xf32>
    %367 = arith.addf %366, %365 : vector<8x256xf32>
    %c0_231 = arith.constant 0 : index
    %c0_232 = arith.constant 0 : index
    %368 = vector.load %arg12[%c0_231, %c0_232] : memref<8x256xf32, #tpu.memory_space<vmem>>, vector<8x256xf32>
    tpu.vector_store %arg12[%c0_231, %c0_232], %367 {strides = array<i32>} : memref<8x256xf32, #tpu.memory_space<vmem>>, vector<8x256xf32>,
    %c0_233 = arith.constant 0 : index
    %c0_234 = arith.constant 0 : index
    %369 = vector.load %arg12[%c0_233, %c0_234] : memref<8x256xf32, #tpu.memory_space<vmem>>, vector<8x256xf32>
    %370 = vector.extract_strided_slice %369 {offsets = [0, 0], sizes = [8, 128], strides = [1, 1]} : vector<8x256xf32> to vector<8x128xf32>
    %371 = vector.extract_strided_slice %369 {offsets = [0, 128], sizes = [8, 128], strides = [1, 1]} : vector<8x256xf32> to vector<8x128xf32>
    %372 = vector.extract_strided_slice %45 {offsets = [0, 0], sizes = [8, 1], strides = [1, 1]} : vector<8x128xf32> to vector<8x1xf32>
    %373 = vector.broadcast %372 : vector<8x1xf32> to vector<8x128xf32>
    %374 = arith.mulf %33, %373 : vector<8x128xf32>
    %375 = vector.extract_strided_slice %45 {offsets = [0, 1], sizes = [8, 1], strides = [1, 1]} : vector<8x128xf32> to vector<8x1xf32>
    %376 = vector.broadcast %375 : vector<8x1xf32> to vector<8x128xf32>
    %377 = arith.mulf %34, %376 : vector<8x128xf32>
    %378 = arith.addf %374, %377 : vector<8x128xf32>
    %379 = vector.extract_strided_slice %45 {offsets = [0, 2], sizes = [8, 1], strides = [1, 1]} : vector<8x128xf32> to vector<8x1xf32>
    %380 = vector.broadcast %379 : vector<8x1xf32> to vector<8x128xf32>
    %381 = arith.mulf %370, %380 : vector<8x128xf32>
    %382 = arith.addf %378, %381 : vector<8x128xf32>
    %383 = vector.extract_strided_slice %45 {offsets = [0, 3], sizes = [8, 1], strides = [1, 1]} : vector<8x128xf32> to vector<8x1xf32>
    %384 = vector.broadcast %383 : vector<8x1xf32> to vector<8x128xf32>
    %385 = arith.mulf %371, %384 : vector<8x128xf32>
    %386 = arith.addf %382, %385 : vector<8x128xf32>
    %cst_235 = arith.constant 9.99999974E-6 : f32
    %387 = vector.broadcast %cst_235 : f32 to vector<8x1xf32>
    %388 = arith.addf %13, %387 : vector<8x1xf32>
    %389 = arith.mulf %388, %16 : vector<8x1xf32>
    %390 = vector.broadcast %2 : vector<8x1xf32> to vector<8x128xf32>
    %391 = arith.subf %386, %390 : vector<8x128xf32>
    %cst_236 = arith.constant 9.99999974E-6 : f32
    %392 = vector.broadcast %cst_236 : f32 to vector<8x1xf32>
    %393 = arith.addf %1, %392 : vector<8x1xf32>
    %394 = vector.broadcast %393 : vector<8x1xf32> to vector<8x128xf32>
    %395 = arith.divf %391, %394 : vector<8x128xf32>
    %396 = vector.broadcast %389 : vector<8x1xf32> to vector<8x128xf32>
    %397 = arith.mulf %395, %396 : vector<8x128xf32>
    %398 = vector.broadcast %6 : vector<8x1xf32> to vector<8x128xf32>
    %399 = arith.addf %397, %398 : vector<8x128xf32>
    %c0_237 = arith.constant 0 : index
    %c0_238 = arith.constant 0 : index
    %400 = vector.load %arg10[%c0_237, %c0_238] : memref<8x128xf32, #tpu.memory_space<vmem>>, vector<8x128xf32>
    tpu.vector_store %arg10[%c0_237, %c0_238], %399 {strides = array<i32>} : memref<8x128xf32, #tpu.memory_space<vmem>>, vector<8x128xf32>,
    return
  }
  func.func @transform_0(%arg0: i32) -> (i32, i32) {
    %c0_i32 = arith.constant 0 : i32
    %c0_i32_0 = arith.constant 0 : i32
    return %arg0, %c0_i32 : i32, i32
  }
  func.func @transform_1(%arg0: i32) -> (i32, i32) {
    %c0_i32 = arith.constant 0 : i32
    %c0_i32_0 = arith.constant 0 : i32
    return %arg0, %c0_i32 : i32, i32
  }
  func.func @transform_2(%arg0: i32) -> (i32, i32) {
    %c0_i32 = arith.constant 0 : i32
    %c0_i32_0 = arith.constant 0 : i32
    %c0_i32_1 = arith.constant 0 : i32
    return %c0_i32, %c0_i32_0 : i32, i32
  }
  func.func @transform_3(%arg0: i32) -> (i32, i32) {
    %c0_i32 = arith.constant 0 : i32
    %c0_i32_0 = arith.constant 0 : i32
    %c0_i32_1 = arith.constant 0 : i32
    return %c0_i32, %c0_i32_0 : i32, i32
  }
  func.func @transform_4(%arg0: i32) -> (i32, i32) {
    %c0_i32 = arith.constant 0 : i32
    %c0_i32_0 = arith.constant 0 : i32
    %c0_i32_1 = arith.constant 0 : i32
    return %c0_i32, %c0_i32_0 : i32, i32
  }
  func.func @transform_5(%arg0: i32) -> (i32, i32) {
    %c0_i32 = arith.constant 0 : i32
    %c0_i32_0 = arith.constant 0 : i32
    %c0_i32_1 = arith.constant 0 : i32
    return %c0_i32, %c0_i32_0 : i32, i32
  }
  func.func @transform_6(%arg0: i32) -> (i32, i32) {
    %c0_i32 = arith.constant 0 : i32
    %c0_i32_0 = arith.constant 0 : i32
    %c0_i32_1 = arith.constant 0 : i32
    return %c0_i32, %c0_i32_0 : i32, i32
  }
  func.func @transform_7(%arg0: i32) -> (i32, i32) {
    %c0_i32 = arith.constant 0 : i32
    %c0_i32_0 = arith.constant 0 : i32
    %c0_i32_1 = arith.constant 0 : i32
    return %c0_i32, %c0_i32_0 : i32, i32
  }
  func.func @transform_8(%arg0: i32) -> (i32, i32) {
    %c0_i32 = arith.constant 0 : i32
    %c0_i32_0 = arith.constant 0 : i32
    %c0_i32_1 = arith.constant 0 : i32
    return %c0_i32, %c0_i32_0 : i32, i32
  }
  func.func @transform_9(%arg0: i32) -> (i32, i32) {
    %c0_i32 = arith.constant 0 : i32
    %c0_i32_0 = arith.constant 0 : i32
    return %arg0, %c0_i32 : i32, i32
  }
}

</mosaic_0001>

<bundles_post_ra>
// kernel: tpu_custom_call.1
= control target key start
LH: loop header
LB: loop body
LE: loop exit
PB: predicated region body
PF: predicated region fallthrough
CT: control target
= control target key end

     0   :  { %s4190_s0 = inlined_call_operand.hbm [shape: f32[16,128], index: 0, kind: input, shape index: {}]   ;;  %s4191_s1 = inlined_call_operand.hbm [shape: f32[16,128], index: 1, kind: input, shape index: {}]   ;;  %s4192_s2 = inlined_call_operand.hbm [shape: f32[128,384], index: 2, kind: input, shape index: {}]   ;;  %s4193_s3 = inlined_call_operand.hbm [shape: f32[128,384], index: 3, kind: input, shape index: {}]   ;;  %s4194_s4 = inlined_call_operand.vmem [shape: f32[1,384], index: 4, kind: input, shape index: {}]   ;;  %s4195_s5 = inlined_call_operand.hbm [shape: f32[128,256], index: 5, kind: input, shape index: {}]   ;;  %s4196_s6 = inlined_call_operand.hbm [shape: f32[128,256], index: 6, kind: input, shape index: {}]   ;;  %s4197_s7 = inlined_call_operand.hbm [shape: f32[128,256], index: 7, kind: input, shape index: {}]   ;;  %s4198_s8 = inlined_call_operand.hbm [shape: f32[128,256], index: 8, kind: input, shape index: {}]   ;;  %s4199_s9 = inlined_call_operand.hbm [shape: f32[16,128], index: 9, kind: output, shape index: {}]  }
   0x1   :  { %4207 = sst [smem:[#allocation30_spill]] %s4192_s2 }
   0x2   :  { %4208 = sst [smem:[#allocation31_spill]] %s4193_s3 }
   0x3   :  { %4209 = sst [smem:[#allocation32_spill]] %s4195_s5 }
   0x4   :  { %4210 = sst [smem:[#allocation33_spill]] %s4196_s6 }
   0x5   :  { %4211 = sst [smem:[#allocation34_spill]] %s4197_s7 }
   0x6   :  { %4212 = sst [smem:[#allocation35_spill]] %s4199_s9 }
   0x7   :  { %14 = vsyncpa [#allocation5], 0 }
   0x8   :  { %16 = vsyncpa [#allocation5 + $0x1], 0 }
   0x9   :  { %17 = vsyncpa [#allocation8], 0 }
   0xa   :  { %19 = vsyncpa [#allocation8 + $0x1], 0 }
   0xb   :  { %20 = vsyncpa [#allocation11], 0 }
   0xc   :  { %21 = vsyncpa [#allocation14], 0 }
   0xd   :  { %22 = vsyncpa [#allocation17], 0 }
   0xe   :  { %23 = vsyncpa [#allocation6], 0 }
   0xf   :  { %25 = vsyncpa [#allocation6 + $0x1], 0  ;;  %s3262_s30 = smov 0   ;;  %s3264_s10 = smov 0  }
  0x10   :  { %s3266_s11 = smov 0   ;;  %s3268_s12 = smov 0  }
  0x11 LB: > { %s3180_s13 = smov [#allocation9]   ;;  %s3283_s15 = sadd.s32 4294967295, %s3178_s12   ;;  %s3178_s12 = sphi %s3268_s12, %s4271_s12   ;;  %s3174_s11 = sphi %s3266_s11, %s4270_s11   ;;  %s3170_s10 = sphi %s3264_s10, %s4269_s10   ;;  %s3166_s30 = sphi %s3262_s30, %s4268_s30  }
  0x12   : > { %s273_s14 = sshll.u32 %s3180_s13, 4  ;;  %p2390_p0 = scmp.ge.s32.totalorder %s3178_s12, 1  ;;  %s3288_s14 = int_to_ptr.vmem [resolvable:$true] %s273_s14 }
  0x13   : > { %p4201_p1 = scmp.eq.s32.totalorder %s3283_s15, 0  ;;  %p261_p2 = scmp.lt.s32.totalorder %s3178_s12, 3 }
  0x14   : > { %s3181_s17 = smov [#allocation10]   ;;  %s3182_s20 = smov [#allocation13]  }
  0x15   : > { %p3290_p3 = pnand %p2390_p0, %p261_p2  ;;  %s286_s18 = sshll.u32 %s3181_s17, 4  ;;  %s3303_s18 = int_to_ptr.vmem [resolvable:$true] %s286_s18 }
  0x16   : > { %s3305_s21 = sshll.u32 %s3182_s20, 4  ;;  %s4215_s2 = sld [smem:[#allocation30_spill]]  ;;  %s316_s21 = int_to_ptr.vmem [resolvable:$true] %s3305_s21 }
  0x17   : > { %s4213_s16 = scalar_select %p3290_p3, 1, 0 }
  0x18   : > { %p2664_p5 = pneg %p3290_p3 }
  0x1a   : > { %p3299_p6 = pnand %p2664_p5, %p4201_p1 }
  0x1c   : > { %s2864_s24 = scalar_lea.hbm %s4215_s2, 6144  ;;  %p3315_p8 = pneg %p3299_p6 }
  0x1d   : > { %p2865_p7 = scmp.ne.s32.totalorder %s4215_s2, %s2864_s24  ;;  %p2871_p11 = scmp.lt.u32.totalorder %s2864_s24, %s4215_s2 }
  0x1f   : > { %p2867_p9 = pnand %p3315_p8, %p2865_p7 }
  0x21   : > { %p2868_p10 = pneg %p2867_p9 }
  0x23   : > { %p2873_p12 = pnand %p2871_p11, %p2868_p10 }
  0x25   : > { %2876 = shalt.err (!%p2873_p12)
}
  0x26   : > { %s2877_s13 = scalar_lea.vmem %s3288_s14, 6144  ;;  %p2885_p5 = scmp.lt.s32.totalorder %s3288_s14, %s3288_s14 }
  0x27   : > { %p2878_p13 = scmp.ne.s32.totalorder %s3288_s14, %s2877_s13  ;;  %p2886_p4 = scmp.lt.s32.totalorder %s2877_s13, %s2877_s13 }
  0x29   : > { %p2880_p0 = pnand %p2878_p13, %p3315_p8  ;;  %p2887_p7 = por %p2886_p4, %p2885_p5 }
  0x2b   : > { %p2881_p2 = pneg %p2880_p0 }
  0x2d   : > { %p2888_p9 = pnand %p2887_p7, %p2881_p2 }
  0x2f   : > { %2891 = shalt.err (!%p2888_p9)
}
  0x30   : > { %s3183_s17 = smov 384   ;;  %s3184_s20 = smov 24  }
  0x31   : > { %2667 = dma.hbm_to_vmem [thread:$0]  (!%p3299_p6), %s4215_s2, 6144, %s3288_s14, [#allocation8], %s3183_s17, %s3183_s17, %s3184_s20  }
  0x32   : > { %s4217_s3 = sld [smem:[#allocation31_spill]] }
  0x38   : > { %s2892_s26 = scalar_lea.hbm %s4217_s3, 6144 }
  0x39   : > { %p2893_p4 = scmp.ne.s32.totalorder %s4217_s3, %s2892_s26  ;;  %p2899_p12 = scmp.lt.u32.totalorder %s2892_s26, %s4217_s3 }
  0x3b   : > { %p2895_p10 = pnand %p2893_p4, %p3315_p8 }
  0x3d   : > { %p2896_p11 = pneg %p2895_p10 }
  0x3f   : > { %p2901_p13 = pnand %p2899_p12, %p2896_p11 }
  0x41   : > { %2904 = shalt.err (!%p2901_p13)
}
  0x42   : > { %s2905_s14 = scalar_lea.vmem %s3303_s18, 6144  ;;  %p2913_p7 = scmp.lt.s32.totalorder %s3303_s18, %s3303_s18 }
  0x43   : > { %p2906_p0 = scmp.ne.s32.totalorder %s3303_s18, %s2905_s14  ;;  %p2914_p9 = scmp.lt.s32.totalorder %s2905_s14, %s2905_s14 }
  0x45   : > { %p2908_p2 = pnand %p2906_p0, %p3315_p8  ;;  %p2915_p4 = por %p2914_p9, %p2913_p7 }
  0x47   : > { %p2909_p5 = pneg %p2908_p2 }
  0x49   : > { %p2916_p10 = pnand %p2915_p4, %p2909_p5 }
  0x4b   : > { %2919 = shalt.err (!%p2916_p10)
}
  0x4c   : > { %2670 = dma.hbm_to_vmem [thread:$0]  (!%p3299_p6), %s4217_s3, 6144, %s3303_s18, [#allocation11], %s3183_s17, %s3183_s17, %s3184_s20  }
  0x4d   : > { %s4218_s6 = sld [smem:[#allocation33_spill]] }
  0x53   : > { %s2920_s25 = scalar_lea.hbm %s4218_s6, 4096 }
  0x54   : > { %p2921_p11 = scmp.ne.s32.totalorder %s4218_s6, %s2920_s25  ;;  %p2927_p0 = scmp.lt.u32.totalorder %s2920_s25, %s4218_s6 }
  0x56   : > { %p2923_p12 = pnand %p2921_p11, %p3315_p8 }
  0x58   : > { %p2924_p13 = pneg %p2923_p12 }
  0x5a   : > { %p2929_p2 = pnand %p2927_p0, %p2924_p13 }
  0x5c   : > { %2932 = shalt.err (!%p2929_p2)
}
  0x5d   : > { %s2933_s14 = scalar_lea.vmem %s316_s21, 4096  ;;  %p2941_p4 = scmp.lt.s32.totalorder %s316_s21, %s316_s21 }
  0x5e   : > { %p2934_p5 = scmp.ne.s32.totalorder %s316_s21, %s2933_s14  ;;  %p2942_p10 = scmp.lt.s32.totalorder %s2933_s14, %s2933_s14 }
  0x60   : > { %p2936_p7 = pnand %p2934_p5, %p3315_p8  ;;  %p2943_p1 = por %p2942_p10, %p2941_p4 }
  0x62   : > { %p2937_p9 = pneg %p2936_p7 }
  0x64   : > { %p2944_p3 = pnand %p2943_p1, %p2937_p9 }
  0x66   : > { %2947 = shalt.err (!%p2944_p3)
}
  0x67   : > { %s3185_s18 = smov 256   ;;  %s3186_s17 = smov 16  }
  0x68   : > { %2676 = dma.hbm_to_vmem [thread:$0]  (!%p3299_p6), %s4218_s6, 4096, %s316_s21, [#allocation14], %s3185_s18, %s3185_s18, %s3186_s17  }
  0x69   : > { %s3187_s22 = smov [#allocation12]   ;;  %s3188_s24 = smov [#allocation15]  }
  0x6a   : > { %s302_s23 = sshll.u32 %s3187_s22, 4  ;;  %s328_s25 = sshll.u32 %s3188_s24, 4  ;;  %s303_s23 = int_to_ptr.vmem [resolvable:$true] %s302_s23  ;;  %s329_s25 = int_to_ptr.vmem [resolvable:$true] %s328_s25 }
  0x6b   : > { %s4219_s5 = sld [smem:[#allocation32_spill]] }
  0x71   : > { %s2948_s29 = scalar_lea.hbm %s4219_s5, 4096 }
  0x72   : > { %p2949_p1 = scmp.ne.s32.totalorder %s4219_s5, %s2948_s29  ;;  %p2955_p12 = scmp.lt.u32.totalorder %s2948_s29, %s4219_s5 }
  0x74   : > { %p2951_p3 = pnand %p2949_p1, %p3315_p8 }
  0x76   : > { %p2952_p11 = pneg %p2951_p3 }
  0x78   : > { %p2957_p13 = pnand %p2955_p12, %p2952_p11 }
  0x7a   : > { %2960 = shalt.err (!%p2957_p13)
}
  0x7b   : > { %s2961_s21 = scalar_lea.vmem %s303_s23, 4096  ;;  %p2969_p7 = scmp.lt.s32.totalorder %s303_s23, %s303_s23 }
  0x7c   : > { %p2962_p0 = scmp.ne.s32.totalorder %s303_s23, %s2961_s21  ;;  %p2970_p9 = scmp.lt.s32.totalorder %s2961_s21, %s2961_s21 }
  0x7e   : > { %p2964_p2 = pnand %p2962_p0, %p3315_p8  ;;  %p2971_p4 = por %p2970_p9, %p2969_p7 }
  0x80   : > { %p2965_p5 = pneg %p2964_p2 }
  0x82   : > { %p2972_p10 = pnand %p2971_p4, %p2965_p5 }
  0x84   : > { %2975 = shalt.err (!%p2972_p10)
}
  0x85   : > { %2673 = dma.hbm_to_vmem [thread:$0]  (!%p3299_p6), %s4219_s5, 4096, %s303_s23, [#allocation11], %s3185_s18, %s3185_s18, %s3186_s17  }
  0x86   : > { %s4220_s7 = sld [smem:[#allocation34_spill]] }
  0x8c   : > { %s2976_s22 = scalar_lea.hbm %s4220_s7, 4096 }
  0x8d   : > { %p2977_p1 = scmp.ne.s32.totalorder %s4220_s7, %s2976_s22  ;;  %p2983_p12 = scmp.lt.u32.totalorder %s2976_s22, %s4220_s7 }
  0x8f   : > { %p2979_p3 = pnand %p2977_p1, %p3315_p8 }
  0x91   : > { %p2980_p11 = pneg %p2979_p3 }
  0x93   : > { %p2985_p13 = pnand %p2983_p12, %p2980_p11 }
  0x95   : > { %2988 = shalt.err (!%p2985_p13)
}
  0x96   : > { %s2989_s13 = scalar_lea.vmem %s329_s25, 4096  ;;  %p2997_p7 = scmp.lt.s32.totalorder %s329_s25, %s329_s25 }
  0x97   : > { %p2990_p0 = scmp.ne.s32.totalorder %s329_s25, %s2989_s13  ;;  %p2998_p9 = scmp.lt.s32.totalorder %s2989_s13, %s2989_s13 }
  0x99   : > { %p2992_p2 = pnand %p2990_p0, %p3315_p8  ;;  %p2999_p4 = por %p2998_p9, %p2997_p7 }
  0x9b   : > { %p2993_p5 = pneg %p2992_p2 }
  0x9d   : > { %p3000_p10 = pnand %p2999_p4, %p2993_p5 }
  0x9f   : > { %3003 = shalt.err (!%p3000_p10)
}
  0xa0   : > { %2679 = dma.hbm_to_vmem [thread:$0]  (!%p3299_p6), %s4220_s7, 4096, %s329_s25, [#allocation14], %s3185_s18, %s3185_s18, %s3186_s17  }
  0xa1   : > { %s3189_s21 = smov [#allocation16]   ;;  %s3004_s9 = scalar_lea.hbm %s4198_s8, 4096 }
  0xa2   : > { %s341_s2 = sshll.u32 %s3189_s21, 4  ;;  %p3005_p1 = scmp.ne.s32.totalorder %s4198_s8, %s3004_s9  ;;  %s342_s2 = int_to_ptr.vmem [resolvable:$true] %s341_s2 }
  0xa3   : > { %p3011_p12 = scmp.lt.u32.totalorder %s3004_s9, %s4198_s8 }
  0xa4   : > { %p3007_p3 = pnand %p3005_p1, %p3315_p8 }
  0xa6   : > { %p3008_p11 = pneg %p3007_p3 }
  0xa8   : > { %p3013_p13 = pnand %p3011_p12, %p3008_p11 }
  0xaa   : > { %3016 = shalt.err (!%p3013_p13)
}
  0xab   : > { %s3017_s25 = scalar_lea.vmem %s342_s2, 4096  ;;  %p3025_p7 = scmp.lt.s32.totalorder %s342_s2, %s342_s2 }
  0xac   : > { %p3018_p0 = scmp.ne.s32.totalorder %s342_s2, %s3017_s25  ;;  %p3026_p9 = scmp.lt.s32.totalorder %s3017_s25, %s3017_s25 }
  0xae   : > { %p3020_p2 = pnand %p3018_p0, %p3315_p8  ;;  %p3027_p4 = por %p3026_p9, %p3025_p7 }
  0xb0   : > { %p3021_p5 = pneg %p3020_p2 }
  0xb2   : > { %p3028_p10 = pnand %p3027_p4, %p3021_p5 }
  0xb4   : > { %3031 = shalt.err (!%p3028_p10)
}
  0xb5   : > { %2682 = dma.hbm_to_vmem [thread:$0]  (!%p3299_p6), %s4198_s8, 4096, %s342_s2, [#allocation17], %s3185_s18, %s3185_s18, %s3186_s17  }
  0xb6   : > { %s2389_s19 = sadd.s32 4294967294, %s3178_s12   ;;  %s3446_s27 = sadd.s32 1, %s3178_s12  }
  0xb7   : > { %s35_s23 = ssub.s32 %s3178_s12, %s3446_s27  ;;  %s38_s14 = sadd.s32 1, %s3174_s11 }
  0xb8   : > { %p36_p8 = scmp.eq.s32.totalorder %s35_s23, 0  ;;  %p45_p1 = scmp.ne.s32.totalorder %s3174_s11, %s3170_s10 }
  0xb9   : > { %p46_p3 = scmp.eq.s32.totalorder %s3178_s12, 0  ;;  %p51_p11 = scmp.ne.s32.totalorder %s3170_s10, %s3166_s30 }
  0xba   : > { %s3457_s21 = scalar_select %p36_p8, %s3174_s11, %s38_s14  }
  0xbb   : > { %p3459_p12 = por %p46_p3, %p45_p1  ;;  %p4222_p13 = scmp.eq.s32.totalorder %s3283_s15, 0 }
  0xbc   : > { %p248_p0 = scmp.eq.s32.totalorder %s3283_s15, 1  ;;  %p254_p2 = scmp.eq.s32.totalorder %s2389_s19, 1 }
  0xbd   : > { %p3465_p6 = por %p4222_p13, %p51_p11  ;;  %p2700_p5 = scmp.lt.s32.totalorder %s3178_s12, 2 }
  0xbe   : > { %s355_s17 = sand.u32 1, %s3174_s11   ;;  %p3472_p7 = por %p248_p0, %p45_p1 }
  0xbf   : > { %s4223_s18 = scalar_select %p3465_p6, 1, 0 }
  0xc0   : > { %s4224_s2 = scalar_select %p3472_p7, 1, 0 }
  0xc1   : > { %p3476_p9 = por %p254_p2, %p51_p11  ;;  %s3480_s9 = sshll.u32 %s355_s17, 3 }
  0xc2   : > { %s2399_s22 = sshll.u32 %s3178_s12, 7  ;;  %s359_s25 = scalar_lea.vmem [#allocation4], %s3480_s9 }
  0xc3   : > { %s4225_s20 = scalar_select %p3476_p9, 1, 0 }
  0xc4   : > { %s3486_s28 = scalar_lea.hbm %s4190_s0, %s2399_s22  ;;  %s366_s29 = sshll.u32 %s359_s25, 4  ;;  %s3489_s29 = int_to_ptr.vmem [resolvable:$true] %s366_s29 }
  0xc5   : > { %p3493_p4 = pnand %p2700_p5, %p3459_p12  ;;  %s3500_s14 = scalar_lea.hbm %s4191_s1, %s2399_s22 }
  0xc6   : > { %s373_s24 = sand.u32 1, %s3178_s12   ;;  %s356_s26 = scalar_lea.sflag [#allocation5], %s355_s17 }
  0xc7   : > { %s3032_s5 = scalar_lea.hbm %s3486_s28, 128  ;;  %p3034_p8 = pneg %p3493_p4 }
  0xc8   : > { %p3033_p10 = scmp.ne.s32.totalorder %s3486_s28, %s3032_s5  ;;  %s3037_s6 = scalar_lea.hbm %s4190_s0, 256 }
  0xc9   : > { %p3038_p11 = scmp.lt.u32.totalorder %s3486_s28, %s4190_s0  ;;  %p3039_p12 = scmp.lt.u32.totalorder %s3037_s6, %s3032_s5 }
  0xca   : > { %p3035_p1 = pnand %p3034_p8, %p3033_p10  ;;  %p3041_p0 = scmp.lt.u32.totalorder %s3032_s5, %s3486_s28 }
  0xcb   : > { %p3040_p13 = por %p3039_p12, %p3038_p11 }
  0xcc   : > { %p3036_p3 = pneg %p3035_p1 }
  0xcd   : > { %p3042_p2 = por %p3041_p0, %p3040_p13 }
  0xcf   : > { %p3043_p5 = pnand %p3042_p2, %p3036_p3 }
  0xd1   : > { %3046 = shalt.err (!%p3043_p5)
}
  0xd2   : > { %s3047_s17 = scalar_lea.vmem %s3489_s29, 128  ;;  %s3190_s22 = smov [#allocation4]  }
  0xd3   : > { %p3048_p10 = scmp.ne.s32.totalorder %s3489_s29, %s3047_s17  ;;  %s3052_s23 = sshll.u32 %s3190_s22, 4  ;;  %s3053_s23 = int_to_ptr.vmem [resolvable:$false] %s3052_s23 }
  0xd4   : > { %s3054_s7 = scalar_lea.vmem %s3053_s23, 256  ;;  %p3055_p7 = scmp.lt.s32.totalorder %s3489_s29, %s3053_s23 }
  0xd5   : > { %p3050_p1 = pnand %p3048_p10, %p3034_p8  ;;  %p3056_p11 = scmp.lt.s32.totalorder %s3054_s7, %s3047_s17 }
  0xd7   : > { %p3051_p9 = pneg %p3050_p1  ;;  %p3057_p12 = por %p3056_p11, %p3055_p7 }
  0xd9   : > { %p3058_p13 = pnand %p3057_p12, %p3051_p9 }
  0xdb   : > { %3061 = shalt.err (!%p3058_p13)
}
  0xdc   : > { %2686 = dma.hbm_to_vmem [thread:$0]  (!%p3493_p4), %s3486_s28, 128, %s3489_s29, %s356_s26  }
  0xdd   : > { %s377_s5 = scalar_lea.vmem [#allocation7], %s3480_s9  ;;  %s374_s3 = scalar_lea.sflag [#allocation8], %s373_s24 }
  0xde   : > { %s384_s6 = sshll.u32 %s377_s5, 4  ;;  %s3062_s25 = scalar_lea.hbm %s3500_s14, 128  ;;  %s385_s6 = int_to_ptr.vmem [resolvable:$true] %s384_s6 }
  0xdf   : > { %p3063_p7 = scmp.ne.s32.totalorder %s3500_s14, %s3062_s25  ;;  %s3067_s22 = scalar_lea.hbm %s4191_s1, 256 }
  0xe0   : > { %p3068_p0 = scmp.lt.u32.totalorder %s3500_s14, %s4191_s1  ;;  %p3069_p2 = scmp.lt.u32.totalorder %s3067_s22, %s3062_s25 }
  0xe1   : > { %p3065_p9 = pnand %p3063_p7, %p3034_p8  ;;  %p3071_p10 = scmp.lt.u32.totalorder %s3062_s25, %s3500_s14 }
  0xe2   : > { %p3070_p5 = por %p3069_p2, %p3068_p0 }
  0xe3   : > { %p3066_p3 = pneg %p3065_p9 }
  0xe4   : > { %p3072_p1 = por %p3071_p10, %p3070_p5 }
  0xe6   : > { %p3073_p11 = pnand %p3072_p1, %p3066_p3 }
  0xe8   : > { %3076 = shalt.err (!%p3073_p11)
}
  0xe9   : > { %s3077_s9 = scalar_lea.vmem %s385_s6, 128  ;;  %s3191_s28 = smov [#allocation7]  }
  0xea   : > { %p3078_p12 = scmp.ne.s32.totalorder %s385_s6, %s3077_s9  ;;  %s3082_s29 = sshll.u32 %s3191_s28, 4  ;;  %s3083_s29 = int_to_ptr.vmem [resolvable:$false] %s3082_s29 }
  0xeb   : > { %s3084_s24 = scalar_lea.vmem %s3083_s29, 256  ;;  %p3085_p9 = scmp.lt.s32.totalorder %s385_s6, %s3083_s29 }
  0xec   : > { %p3080_p13 = pnand %p3078_p12, %p3034_p8  ;;  %p3086_p6 = scmp.lt.s32.totalorder %s3084_s24, %s3077_s9 }
  0xee   : > { %p3081_p7 = pneg %p3080_p13  ;;  %p3087_p0 = por %p3086_p6, %p3085_p9 }
  0xf0   : > { %p3088_p2 = pnand %p3087_p0, %p3081_p7 }
  0xf2   : > { %3091 = shalt.err (!%p3088_p2)
}
  0xf3   : > { %2689 = dma.hbm_to_vmem [thread:$0]  (!%p3493_p4), %s3500_s14, 128, %s385_s6, %s374_s3  }
  0xf4   : > { %p4227_p3 = scmp.ne.s32.totalorder %s4213_s16, 0 }
  0xf6   : > { %393 = sbr.rel (%p4227_p3) target bundleno = 1299 (0x513), region = 56 }
  0xfd   : > { %s3553_s26 = sand.u32 1, %s3170_s10   ;;  %p4228_p6 = scmp.ne.s32.totalorder %s4223_s18, 0 }
  0xfe   : > { %s3556_s5 = sshll.u32 %s3553_s26, 3  ;;  %s396_s25 = scalar_lea.sflag [#allocation5], %s3553_s26 }
  0xff   : > { %s399_s19 = scalar_lea.vmem [#allocation4], %s3556_s5 }
 0x100   : > { %3137 = dma.done.wait (%p4228_p6), %s396_s25, 128  }
 0x101   : > { %3139 = vsyncadd (%p4228_p6), %s396_s25, 4294967168  ;;  %s404_s16 = sand.u32 1, %s3283_s15   ;;  %s408_s14 = scalar_lea.vmem [#allocation7], %s3556_s5 }
 0x102   : > { %s405_s13 = scalar_lea.sflag [#allocation8], %s404_s16 }
 0x103   : > { %3141 = dma.done.wait (%p4228_p6), %s405_s13, 128  }
 0x104   : > { %3143 = vsyncadd (%p4228_p6), %s405_s13, 4294967168  ;;  %p4229_p4 = scmp.eq.s32.totalorder %s3283_s15, 0 }
 0x106   : > { %3145 = dma.done.wait (%p4229_p4), [#allocation8], 6144   ;;  %p4230_p8 = pmov %p4229_p4 }
 0x107   : > { %p4231_p5 = pmov %p4229_p4 }
 0x108   : > { %3147 = vsyncadd (%p4230_p8), [#allocation8], 4294961152 }
 0x109   : > { %3149 = dma.done.wait (%p4231_p5), [#allocation11], 10240   ;;  %p4232_p10 = pmov %p4229_p4 }
 0x10a   : > { %p4233_p1 = pmov %p4229_p4 }
 0x10b   : > { %3151 = vsyncadd (%p4232_p10), [#allocation11], 4294957056 }
 0x10c   : > { %3153 = dma.done.wait (%p4233_p1), [#allocation14], 8192   ;;  %p4234_p11 = pmov %p4233_p1 }
 0x10d   : > { %p4235_p12 = pmov %p4233_p1 }
 0x10e   : > { %3155 = vsyncadd (%p4234_p11), [#allocation14], 4294959104 }
 0x10f   : > { %3157 = dma.done.wait (%p4235_p12), [#allocation17], 4096   ;;  %p4236_p13 = pmov %p4233_p1 }
 0x110   : > { %v3586_v0 = vld [vmem:[%s399_s19] sm:$0xff]  ;;  %v3192_v2 = vmov 0   ;;  %v3193_v7 = vmov 0.0|0.0   ;;  %v551_v8 = vld [vmem:[#allocation10 + $0x18] sm:$0xff]  ;;  %v550_v9 = vld [vmem:[#allocation10 + $0x10] sm:$0xff]  ;;  %vm3196_vm0 = vmmov 0  }
 0x111   : > { %3159 = vsyncadd (%p4236_p13), [#allocation17], 4294963200  ;;  %474 = vadd.xlane.f32.xlu0 %v3586_v0  ;;  %v477_v1 = vmul.f32 %v3586_v0, %v3586_v0  ;;  %2769 = vset.pattern.permute.xlu1 %v3192_v2  ;;  %v549_v3 = vld [vmem:[#allocation10 + $0x8] sm:$0xff]  ;;  %v552_v4 = vld [vmem:[#allocation10 + $0x20] sm:$0xff]  ;;  %s2413_s3 = sshll.u32 %s3283_s15, 7  ;;  %s471_s17 = scalar_lea.vmem [#allocation18], %s3556_s5 }
 0x112   : > { %2771 = vset.pattern.permute.xlu0 %v3192_v2  ;;  %v548_v5 = vld [vmem:[#allocation10] sm:$0xff]  ;;  %v2520_v6 = vpack.c.bf16 %v552_v4, %v549_v3  ;;  %2552 = vmatprep.subr.bf16.mxu1 %v3193_v7  ;;  %v553_v10 = vld [vmem:[#allocation10 + $0x28] sm:$0xff]  ;;  %v555_v13 = vld [vmem:[#allocation10 + $0x38] sm:$0xff]  ;;  %s2239_s22 = sshll.u32 %s471_s17, 4  ;;  %s4264_s9 = sld [smem:[#allocation35_spill]]  ;;  %s4148_s22 = int_to_ptr.vmem [resolvable:$true] %s2239_s22 }
 0x113   : > { %v2522_v11 = vpack.c.bf16 %v551_v8, %v548_v5  ;;  %v2553_v12 = vpack.c.bf16 %v553_v10, %v550_v9  ;;  %v558_v14 = vld [vmem:[#allocation10 + $0x50] sm:$0xff]  ;;  %v557_v17 = vld [vmem:[#allocation10 + $0x48] sm:$0xff]  ;;  %v556_v18 = vld [vmem:[#allocation10 + $0x40] sm:$0xff]  ;;  %s2226_s29 = scalar_lea.sflag [#allocation6], %s3553_s26  ;;  %s3092_s24 = scalar_lea.vmem %s4148_s22, 128 }
 0x114   : > { %v554_v15 = vld [vmem:[#allocation10 + $0x30] sm:$0xff]  ;;  %2521 = vmatprep.subr.bf16.mxu0 %v2520_v6  ;;  %v2524_v16 = vpack.c.bf16 %v558_v14, %v555_v13  ;;  %v559_v19 = vld [vmem:[#allocation10 + $0x58] sm:$0xff]  ;;  %v561_v22 = vld [vmem:[#allocation10 + $0x68] sm:$0xff]  ;;  %p3093_p7 = scmp.ne.s32.totalorder %s4148_s22, %s3092_s24  ;;  %p4265_p9 = scmp.ne.s32.totalorder %s4224_s2, 0 }
 0x115   : > { %478 = vadd.xlane.f32.xlu0 %v477_v1  ;;  %2523 = vmatpush1.bf16.msra.mxu0 %v2522_v11  ;;  %v2526_v20 = vpack.c.bf16 %v557_v17, %v554_v15  ;;  %v2556_v21 = vpack.c.bf16 %v559_v19, %v556_v18  ;;  %v564_v23 = vld [vmem:[#allocation10 + $0x80] sm:$0xff]  ;;  %v563_v26 = vld [vmem:[#allocation10 + $0x78] sm:$0xff]  ;;  %v562_v27 = vld [vmem:[#allocation10 + $0x70] sm:$0xff]  ;;  %s3211_s15 = smov [#allocation18]  }
 0x116   : > { %2554 = vmatpush3.bf16.msra.mxu1 %v2553_v12  ;;  %v560_v24 = vld [vmem:[#allocation10 + $0x60] sm:$0xff]  ;;  %2525 = vmatprep.subr.bf16.mxu0 %v2524_v16  ;;  %v2528_v25 = vpack.c.bf16 %v564_v23, %v561_v22  ;;  %v565_v28 = vld [vmem:[#allocation10 + $0x88] sm:$0xff]  ;;  %v567_v29 = vld [vmem:[#allocation10 + $0x98] sm:$0xff]  ;;  %p3094_p0 = pnand %p3093_p7, %p4265_p9  ;;  %s3096_s5 = sshll.u32 %s3211_s15, 4  ;;  %s3097_s5 = int_to_ptr.vmem [resolvable:$false] %s3096_s5 }
 0x117   : > { %2555 = vmatprep.subr.bf16.mxu1 %v3193_v7  ;;  %v570_v30 = vld [vmem:[#allocation10 + $0xb0] sm:$0xff]  ;;  %v2530_v31 = vpack.c.bf16 %v563_v26, %v560_v24  ;;  %v2559_v32 = vpack.c.bf16 %v565_v28, %v562_v27  ;;  %v569_v35 = vld [vmem:[#allocation10 + $0xa8] sm:$0xff]  ;;  %v568_v36 = vld [vmem:[#allocation10 + $0xa0] sm:$0xff]  ;;  %s3098_s25 = scalar_lea.vmem %s3097_s5, 256  ;;  %p3099_p3 = scmp.lt.s32.totalorder %s4148_s22, %s3097_s5 }
 0x118   : > { %v566_v33 = vld [vmem:[#allocation10 + $0x90] sm:$0xff]  ;;  %v2532_v34 = vpack.c.bf16 %v570_v30, %v567_v29  ;;  %v571_v37 = vld [vmem:[#allocation10 + $0xb8] sm:$0xff]  ;;  %v573_v38 = vld [vmem:[#allocation10 + $0xc8] sm:$0xff]  ;;  %v3195_v30 = vmov 0.0   ;;  %s4146_s28 = scalar_lea.hbm %s4264_s9, %s2413_s3  ;;  %p3095_p2 = pneg %p3094_p0 }
 0x119   : > { %2527 = vmatpush1.bf16.msra.mxu0 %v2526_v20  ;;  %v576_v39 = vld [vmem:[#allocation10 + $0xe0] sm:$0xff]  ;;  %v2534_v40 = vpack.c.bf16 %v569_v35, %v566_v33  ;;  %v2562_v41 = vpack.c.bf16 %v571_v37, %v568_v36  ;;  %v575_v44 = vld [vmem:[#allocation10 + $0xd8] sm:$0xff]  ;;  %v574_v45 = vld [vmem:[#allocation10 + $0xd0] sm:$0xff]  ;;  %660 = vmatprep.mubr.f32.mxu0 %v3195_v30  ;;  %p3100_p6 = scmp.lt.s32.totalorder %s3098_s25, %s3092_s24 }
 0x11a   : > { %2557 = vmatpush3.bf16.msra.mxu1 %v2556_v21  ;;  %2529 = vmatprep.subr.bf16.mxu0 %v2528_v25  ;;  %v572_v42 = vld [vmem:[#allocation10 + $0xc0] sm:$0xff]  ;;  %v2536_v43 = vpack.c.bf16 %v576_v39, %v573_v38  ;;  %v577_v46 = vld [vmem:[#allocation10 + $0xe8] sm:$0xff]  ;;  %v579_v47 = vld [vmem:[#allocation10 + $0xf8] sm:$0xff]  ;;  %v3194_v25 = vmov 1  }
 0x11b   : > { %2558 = vmatprep.subr.bf16.mxu1 %v3193_v7  ;;  %v582_v48 = vld [vmem:[#allocation10 + $0x110] sm:$0xff]  ;;  %v2538_v49 = vpack.c.bf16 %v575_v44, %v572_v42  ;;  %v2565_v50 = vpack.c.bf16 %v577_v46, %v574_v45  ;;  %v581_v53 = vld [vmem:[#allocation10 + $0x108] sm:$0xff]  ;;  %v580_v54 = vld [vmem:[#allocation10 + $0x100] sm:$0xff]  ;;  %2482 = vmatprep.mubr.msk.f32.mxu1 %vm3196_vm0, %v3195_v30  ;;  %p3101_p4 = por %p3100_p6, %p3099_p3 }
 0x11c   : > { %v578_v51 = vld [vmem:[#allocation10 + $0xf0] sm:$0xff]  ;;  %v2540_v52 = vpack.c.bf16 %v582_v48, %v579_v47  ;;  %v583_v55 = vld [vmem:[#allocation10 + $0x118] sm:$0xff]  ;;  %v585_v5 = vld [vmem:[#allocation10 + $0x128] sm:$0xff] }
 0x11d   : > { %2531 = vmatpush1.bf16.msra.mxu0 %v2530_v31  ;;  %v2542_v56 = vpack.c.bf16 %v581_v53, %v578_v51  ;;  %v2568_v57 = vpack.c.bf16 %v583_v55, %v580_v54  ;;  %v3606_v3 = vld [vmem:[%s408_s14] sm:$0xff]  ;;  %v588_v6 = vld [vmem:[#allocation10 + $0x140] sm:$0xff]  ;;  %v589_v15 = vld [vmem:[#allocation10 + $0x148] sm:$0xff]  ;;  %v3197_v54 = vmov 3   ;;  %p3102_p8 = pnand %p3101_p4, %p3095_p2 }
 0x11e   : > { %2560 = vmatpush3.bf16.msra.mxu1 %v2559_v32  ;;  %2533 = vmatprep.subr.bf16.mxu0 %v2532_v34  ;;  %v2544_v10 = vpack.c.bf16 %v588_v6, %v585_v5  ;;  %v584_v11 = vld [vmem:[#allocation10 + $0x120] sm:$0xff]  ;;  %v587_v12 = vld [vmem:[#allocation10 + $0x138] sm:$0xff]  ;;  %v586_v13 = vld [vmem:[#allocation10 + $0x130] sm:$0xff] }
 0x11f   : > { %2561 = vmatprep.subr.bf16.mxu1 %v3193_v7  ;;  %v2546_v14 = vpack.c.bf16 %v587_v12, %v584_v11  ;;  %v2571_v16 = vpack.c.bf16 %v589_v15, %v586_v13  ;;  %v591_v17 = vld [vmem:[#allocation10 + $0x158] sm:$0xff]  ;;  %v594_v18 = vld [vmem:[#allocation10 + $0x170] sm:$0xff]  ;;  %v593_v21 = vld [vmem:[#allocation10 + $0x168] sm:$0xff] }
 0x120   : > { %v2548_v19 = vpack.c.bf16 %v594_v18, %v591_v17  ;;  %v590_v20 = vld [vmem:[#allocation10 + $0x150] sm:$0xff]  ;;  %v592_v22 = vld [vmem:[#allocation10 + $0x160] sm:$0xff]  ;;  %v595_v24 = vld [vmem:[#allocation10 + $0x178] sm:$0xff] }
 0x121   : > { %2535 = vmatpush1.bf16.msra.mxu0 %v2534_v40  ;;  %v2550_v23 = vpack.c.bf16 %v593_v21, %v590_v20  ;;  %v2574_v26 = vpack.c.bf16 %v595_v24, %v592_v22  ;;  %v501_v27 = vld [vmem:[#allocation9 + $0x8] sm:$0xff]  ;;  %v504_v28 = vld [vmem:[#allocation9 + $0x20] sm:$0xff]  ;;  %v503_v35 = vld [vmem:[#allocation9 + $0x18] sm:$0xff] }
 0x122   : > { %2563 = vmatpush3.bf16.msra.mxu1 %v2562_v41  ;;  %2537 = vmatprep.subr.bf16.mxu0 %v2536_v43  ;;  %v2576_v29 = vpack.c.bf16 %v504_v28, %v501_v27  ;;  %v500_v33 = vld [vmem:[#allocation9] sm:$0xff]  ;;  %v502_v36 = vld [vmem:[#allocation9 + $0x10] sm:$0xff]  ;;  %v505_v37 = vld [vmem:[#allocation9 + $0x28] sm:$0xff] }
 0x123   : > { %2564 = vmatprep.subr.bf16.mxu1 %v3193_v7  ;;  %v507_v39 = vld [vmem:[#allocation9 + $0x38] sm:$0xff]  ;;  %v510_v40 = vld [vmem:[#allocation9 + $0x50] sm:$0xff]  ;;  %v2578_v42 = vpack.c.bf16 %v503_v35, %v500_v33  ;;  %v2609_v43 = vpack.c.bf16 %v505_v37, %v502_v36  ;;  %v509_v46 = vld [vmem:[#allocation9 + $0x48] sm:$0xff] }
 0x124   : > { %v506_v44 = vld [vmem:[#allocation9 + $0x30] sm:$0xff]  ;;  %v2580_v45 = vpack.c.bf16 %v510_v40, %v507_v39  ;;  %v508_v47 = vld [vmem:[#allocation9 + $0x40] sm:$0xff]  ;;  %v511_v48 = vld [vmem:[#allocation9 + $0x58] sm:$0xff] }
 0x125   : > { %2539 = vmatpush1.bf16.msra.mxu0 %v2538_v49  ;;  %v513_v49 = vld [vmem:[#allocation9 + $0x68] sm:$0xff]  ;;  %v2582_v51 = vpack.c.bf16 %v509_v46, %v506_v44  ;;  %v512_v53 = vld [vmem:[#allocation9 + $0x60] sm:$0xff]  ;;  %v526_v17 = vld [vmem:[#allocation9 + $0xd0] sm:$0xff] }
 0x126   : > { %2566 = vmatpush3.bf16.msra.mxu1 %v2565_v50  ;;  %2541 = vmatprep.subr.bf16.mxu0 %v2540_v52  ;;  %v516_v50 = vld [vmem:[#allocation9 + $0x80] sm:$0xff]  ;;  %v2612_v52 = vpack.c.bf16 %v511_v48, %v508_v47  ;;  %v521_v5 = vld [vmem:[#allocation9 + $0xa8] sm:$0xff]  ;;  %v534_v20 = vld [vmem:[#allocation9 + $0x110] sm:$0xff] }
 0x127   : > { %2567 = vmatprep.subr.bf16.mxu1 %v3193_v7  ;;  %v2584_v55 = vpack.c.bf16 %v516_v50, %v513_v49  ;;  %v520_v6 = vld [vmem:[#allocation9 + $0xa0] sm:$0xff]  ;;  %v529_v18 = vld [vmem:[#allocation9 + $0xe8] sm:$0xff]  ;;  %v535_v28 = vld [vmem:[#allocation9 + $0x118] sm:$0xff] }
 0x128   : > { %v528_v11 = vld [vmem:[#allocation9 + $0xe0] sm:$0xff]  ;;  %v2621_v22 = vpack.c.bf16 %v529_v18, %v526_v17  ;;  %v539_v35 = vld [vmem:[#allocation9 + $0x138] sm:$0xff]  ;;  %v538_v36 = vld [vmem:[#allocation9 + $0x130] sm:$0xff] }
 0x129   : > { %2543 = vmatpush1.bf16.msra.mxu0 %v2542_v56  ;;  %v515_v56 = vld [vmem:[#allocation9 + $0x78] sm:$0xff]  ;;  %v532_v27 = vld [vmem:[#allocation9 + $0x100] sm:$0xff]  ;;  %v541_v37 = vld [vmem:[#allocation9 + $0x148] sm:$0xff] }
 0x12a   : > { %2569 = vmatpush3.bf16.msra.mxu1 %v2568_v57  ;;  %2545 = vmatprep.subr.bf16.mxu0 %v2544_v10  ;;  %v514_v57 = vld [vmem:[#allocation9 + $0x70] sm:$0xff]  ;;  %v525_v10 = vld [vmem:[#allocation9 + $0xc8] sm:$0xff]  ;;  %v536_v33 = vld [vmem:[#allocation9 + $0x120] sm:$0xff] }
 0x12b   : > { %2570 = vmatprep.subr.bf16.mxu1 %v3193_v7  ;;  %v2592_v15 = vpack.c.bf16 %v528_v11, %v525_v10  ;;  %v543_v39 = vld [vmem:[#allocation9 + $0x158] sm:$0xff]  ;;  %v546_v40 = vld [vmem:[#allocation9 + $0x170] sm:$0xff]  ;;  %v544_v46 = vld [vmem:[#allocation9 + $0x160] sm:$0xff]  ;;  %v3198_v11 = vmov 2  }
 0x12c   : > { %v542_v44 = vld [vmem:[#allocation9 + $0x150] sm:$0xff]  ;;  %v547_v47 = vld [vmem:[#allocation9 + $0x178] sm:$0xff] }
 0x12d   : > { %2547 = vmatpush1.bf16.msra.mxu0 %v2546_v14  ;;  %v524_v14 = vld [vmem:[#allocation9 + $0xc0] sm:$0xff]  ;;  %v2630_v49 = vpack.c.bf16 %v547_v47, %v544_v46 }
 0x12e   : > { %2572 = vmatpush3.bf16.msra.mxu1 %v2571_v16  ;;  %2549 = vmatprep.subr.bf16.mxu0 %v2548_v19  ;;  %v527_v16 = vld [vmem:[#allocation9 + $0xd8] sm:$0xff] }
 0x12f   : > { %2573 = vmatprep.subr.bf16.mxu1 %v3193_v7  ;;  %v531_v19 = vld [vmem:[#allocation9 + $0xf8] sm:$0xff]  ;;  %v2594_v21 = vpack.c.bf16 %v527_v16, %v524_v14  ;;  %v3201_v14 = vmov 10   ;;  %v3203_v16 = vmov 5  }
 0x130   : > { %v2596_v24 = vpack.c.bf16 %v534_v20, %v531_v19 }
 0x131   : > { %2551 = vmatpush1.bf16.msra.mxu0 %v2550_v23  ;;  %v530_v23 = vld [vmem:[#allocation9 + $0xf0] sm:$0xff] }
 0x132   : > { %2575 = vmatpush3.bf16.msra.mxu1 %v2574_v26  ;;  %2577 = vmatprep.subr.bf16.mxu0 %v2576_v29  ;;  %v533_v26 = vld [vmem:[#allocation9 + $0x108] sm:$0xff] }
 0x133   : > { %2608 = vmatprep.subr.bf16.mxu1 %v3193_v7  ;;  %v537_v29 = vld [vmem:[#allocation9 + $0x128] sm:$0xff] }
 0x19e   : > { %v475_v58 = vpop.xlane.xlu0 %474 }
 0x19f   : > { %v3600_v59 = vmul.f32 0.0625, %v475_v58  ;;  %v517_v58 = vld [vmem:[#allocation9 + $0x88] sm:$0xff] }
 0x1a1   : > { %4237 = vst [vmem:[#allocation26_spill] sm:$0xff] %v3600_v59  ;;  %v481_v61 = vmul.f32 %v3600_v59, %v3600_v59  ;;  %v485_v32 = vsub.f32 %v3586_v0, %v3600_v59 }
 0x1a2   : > { %v479_v60 = vpop.xlane.xlu0 %478 }
 0x1a3   : > { %v480_v62 = vmul.f32 0.0625, %v479_v60  ;;  %v519_v60 = vld [vmem:[#allocation9 + $0x98] sm:$0xff] }
 0x1a5   : > { %v482_v63 = vsub.f32 %v480_v62, %v481_v61  ;;  %v522_v61 = vld [vmem:[#allocation9 + $0xb0] sm:$0xff]  ;;  %v2586_v62 = vpack.c.bf16 %v515_v56, %v512_v53 }
 0x1a7   : > { %v483_v1 = vadd.f32 1e-05, %v482_v63  ;;  %v2615_v63 = vpack.c.bf16 %v517_v58, %v514_v57 }
 0x1a9   : > { %2792 = vrsqrt.f32 %v483_v1 }
 0x1b3   : > { %v2793_v4 = vpop.eup %2792 }
 0x1b4   : > { %v3608_v8 = vmul.f32 %v2793_v4, %v483_v1  ;;  %v486_v9 = vmul.f32 %v2793_v4, %v3606_v3  ;;  %v518_v1 = vld [vmem:[#allocation9 + $0x90] sm:$0xff]  ;;  %v2588_v4 = vpack.c.bf16 %v522_v61, %v519_v60 }
 0x1b5   : > { %v2590_v12 = vpack.c.bf16 %v521_v5, %v518_v1 }
 0x1b6   : > { %4238 = vst [vmem:[#allocation27_spill] sm:$0xff] %v3608_v8  ;;  %489 = vperm.xlu1 %2769, %v486_v9   ;;  %v523_v9 = vld [vmem:[#allocation9 + $0xb8] sm:$0xff] }
 0x1b7   : > { %v2618_v13 = vpack.c.bf16 %v523_v9, %v520_v6 }
 0x1ba   : > { %2770 = vset.pattern.permute.xlu1 %v3194_v25 }
 0x1bb   : > { %495 = vperm.xlu1 %2770, %v3606_v3  }
 0x235   : > { %v490_v31 = vpop.permute.xlu1 %489 }
 0x236   : > { %v492_v34 = vmul.f32 %v490_v31, %v485_v32  ;;  %v2598_v31 = vpack.c.bf16 %v533_v26, %v530_v23  ;;  %v2624_v32 = vpack.c.bf16 %v535_v28, %v532_v27  ;;  %v2214_v23 = vadd.f32 1e-05, %v3606_v3 }
 0x237   : > { %v3207_v26 = vmov 11   ;;  %v3208_v27 = vmov 12   ;;  %v3209_v28 = vmov 14  }
 0x23a   : > { %v3618_v38 = vpop.permute.xlu1 %495 }
 0x23b   : > { %4239 = vst [vmem:[#allocation28_spill] sm:$0xff] %v3618_v38  ;;  %v3621_v41 = vadd.f32 %v3618_v38, %v492_v34 }
 0x23d   : > { %997 = vperm.xlu1 %2770, %v3621_v41   ;;  %v499_v0 = vmul.f32 %v3621_v41, %v3621_v41 }
 0x23f   : > { %661 = vmatmul.mubr.f32.vlgmr.msra.gmra.mrb[0].mxu0 %v499_v0  ;;  %2483 = vmatmul.mubr.f32.vlgmr.msra.gmra.mrb[0].mxu1 %v499_v0  ;;  %v2604_v0 = vpack.c.bf16 %v546_v40, %v543_v39 }
 0x240   : > { %2579 = vmatpush1.bf16.msra.mxu0 %v2578_v42  ;;  %2610 = vmatpush3.bf16.msra.mxu1 %v2609_v43  ;;  %v2602_v42 = vpack.c.bf16 %v539_v35, %v536_v33  ;;  %v2627_v43 = vpack.c.bf16 %v541_v37, %v538_v36  ;;  %v1148_v35 = vld [vmem:[#allocation12 + $0x3] ss:$8 sm:$0x3] }
 0x241   : > { %2773 = vset.pattern.permute.xlu1 %v3197_v54  ;;  %2581 = vmatprep.subr.bf16.mxu0 %v2580_v45  ;;  %v545_v45 = vld [vmem:[#allocation9 + $0x168] sm:$0xff] }
 0x242   : > { %1157 = vperm.xlu1 %2773, %v3621_v41   ;;  %2611 = vmatprep.subr.bf16.mxu1 %v3193_v7  ;;  %v2606_v48 = vpack.c.bf16 %v545_v45, %v542_v44  ;;  %v1150_v44 = vld [vmem:[#allocation13 + $0x3] ss:$8 sm:$0x3] }
 0x243   : > { %801 = vmatprep.mubr.f32.mxu0 %v3195_v30  ;;  %2517 = vmatprep.mubr.msk.f32.mxu1 %vm3196_vm0, %v3195_v30  ;;  %v540_v30 = vld [vmem:[#allocation9 + $0x140] sm:$0xff] }
 0x244   : > { %2583 = vmatpush1.bf16.msra.mxu0 %v2582_v51  ;;  %2613 = vmatpush3.bf16.msra.mxu1 %v2612_v52  ;;  %v2600_v34 = vpack.c.bf16 %v540_v30, %v537_v29  ;;  %v880_v52 = vlaneseq  ;;  %v3210_v29 = vmov 15  }
 0x245   : > { %2585 = vmatprep.subr.bf16.mxu0 %v2584_v55  ;;  %2614 = vmatprep.subr.bf16.mxu1 %v3193_v7  ;;  %v878_v55 = vld [vmem:[%s4194_s4] sm:$0x7] }
 0x246   : > { %v881_v53 = vshrl.u32 %v880_v52, 7  ;;  %2775 = vset.pattern.permute.xlu1 %v3203_v16 }
 0x248   : > { %2587 = vmatpush1.bf16.msra.mxu0 %v2586_v62  ;;  %2616 = vmatpush3.bf16.msra.mxu1 %v2615_v63  ;;  %v3641_v56 = vsub.s32 0, %v881_v53  ;;  %v890_v57 = vsub.s32 2, %v881_v53  ;;  %v3643_v58 = vsub.s32 1, %v881_v53 }
 0x249   : > { %2589 = vmatprep.subr.bf16.mxu0 %v2588_v4  ;;  %2617 = vmatprep.subr.bf16.mxu1 %v3193_v7 }
 0x24a   : > { %v887_v60 = vrot.slane %v878_v55, %v3643_v58  ;;  %v891_v61 = vrot.slane %v878_v55, %v890_v57  ;;  %v1164_v37 = vrot.slane %v1148_v35, %v3641_v56  ;;  %v1168_v39 = vrot.slane %v1148_v35, %v3643_v58  ;;  %v911_v57 = vld [vmem:[#allocation12] ss:$8 sm:$0x3] }
 0x24c   : > { %2591 = vmatpush1.bf16.msra.mxu0 %v2590_v12  ;;  %2619 = vmatpush3.bf16.msra.mxu1 %v2618_v13  ;;  %v3199_v12 = vmov 4   ;;  %v3200_v13 = vmov 7  }
 0x24d   : > { %2593 = vmatprep.subr.bf16.mxu0 %v2592_v15  ;;  %2620 = vmatprep.subr.bf16.mxu1 %v3193_v7  ;;  %v3202_v15 = vmov 13  }
 0x250   : > { %2595 = vmatpush1.bf16.msra.mxu0 %v2594_v21  ;;  %2622 = vmatpush3.bf16.msra.mxu1 %v2621_v22  ;;  %v3204_v21 = vmov 6   ;;  %v3205_v22 = vmov 8  }
 0x251   : > { %2597 = vmatprep.subr.bf16.mxu0 %v2596_v24  ;;  %2623 = vmatprep.subr.bf16.mxu1 %v3193_v7  ;;  %v3206_v24 = vmov 9  }
 0x254   : > { %2599 = vmatpush1.bf16.msra.mxu0 %v2598_v31  ;;  %2625 = vmatpush3.bf16.msra.mxu1 %v2624_v32 }
 0x255   : > { %2601 = vmatprep.subr.bf16.mxu0 %v2600_v34  ;;  %2626 = vmatprep.subr.bf16.mxu1 %v3193_v7  ;;  %v988_v34 = vld [vmem:[#allocation12 + $0x1] ss:$8 sm:$0x3] }
 0x256   : > { %v1004_v36 = vrot.slane %v988_v34, %v3641_v56 }
 0x258   : > { %2603 = vmatpush1.bf16.msra.mxu0 %v2602_v42  ;;  %2628 = vmatpush3.bf16.msra.mxu1 %v2627_v43  ;;  %v990_v42 = vld [vmem:[#allocation13 + $0x1] ss:$8 sm:$0x3] }
 0x259   : > { %2605 = vmatprep.subr.bf16.mxu0 %v2604_v0  ;;  %2629 = vmatprep.subr.bf16.mxu1 %v3193_v7  ;;  %v883_v7 = vrot.slane %v878_v55, %v3641_v56  ;;  %v1019_v0 = vrot.slane %v990_v42, %v3641_v56  ;;  %v1023_v46 = vrot.slane %v990_v42, %v3643_v58 }
 0x25c   : > { %2607 = vmatpush1.bf16.msra.mxu0 %v2606_v48  ;;  %2631 = vmatpush3.bf16.msra.mxu1 %v2630_v49  ;;  %v1179_v48 = vrot.slane %v1150_v44, %v3641_v56  ;;  %v1183_v49 = vrot.slane %v1150_v44, %v3643_v58 }
 0x25f   : > { %802 = vmatmul.mubr.f32.vlgmr.msra.gmra.mrb[0].mxu0 %v3621_v41  ;;  %2518 = vmatmul.mubr.f32.vlgmr.msra.gmra.mrb[2].mxu1 %v3621_v41 }
 0x2bc   : > { %v998_v3 = vpop.permute.xlu1 %997 }
 0x2bd   : > { %v1011_v40 = vsub.f32 %v998_v3, %v1004_v36 }
 0x2bf   : > { %v1013_v45 = vmul.f32 %v1011_v40, %v1011_v40 }
 0x2c1   : > { %v1158_v30 = vpop.permute.xlu1 %1157 }
 0x312   : > { %v733_v50 = vpop.f32.mrb[0].mxu1 }
 0x313   : > { %v2484_v51 = vpop.f32.mrb[1].mxu1 }
 0x314   : > { %v1026_v51 = vmul.f32 %v1019_v0, %v1013_v45 }
 0x332   : > { %v803_v62 = vpop.f32.mrb[0].mxu0  ;;  %v874_v63 = vpop.f32.mrb[2].mxu1 }
 0x333   : > { %v3647_v1 = vadd.f32 %v883_v7, %v803_v62  ;;  %v875_v4 = vadd.f32 %v874_v63, %v733_v50  ;;  %v805_v5 = vpop.f32.mrb[1].mxu0  ;;  %v2519_v6 = vpop.f32.mrb[3].mxu1  ;;  %v1028_v7 = vmul.f32 1.442695, %v1026_v51  ;;  %v924_v63 = vrot.slane %v911_v57, %v3641_v56 }
 0x334   : > { %v3649_v9 = vadd.f32 %v887_v60, %v805_v5  ;;  %v928_v6 = vrot.slane %v911_v57, %v3643_v58 }
 0x335   : > { %v897_v10 = vadd.f32 %v891_v61, %v875_v4  ;;  %v1068_v4 = vld [vmem:[#allocation12 + $0x2] ss:$8 sm:$0x3] }
 0x336   : > { %4240 = vst [vmem:[#allocation29_spill] sm:$0xff] %v3649_v9  ;;  %v1088_v16 = vrot.slane %v1068_v4, %v3643_v58 }
 0x337   : > { %898 = vmax.xlane.f32.xlu0 %v897_v10 }
 0x34d   : > { %917 = vperm.xlu0 %2771, %v3621_v41  }
 0x351   : > { %2772 = vset.pattern.permute.xlu0 %v3198_v11 }
 0x352   : > { %1077 = vperm.xlu0 %2772, %v3621_v41  }
 0x356   : > { %2774 = vset.pattern.permute.xlu0 %v3199_v12  ;;  %v1152_v12 = vld [vmem:[#allocation15 + $0x3] ss:$8 sm:$0x3] }
 0x357   : > { %1237 = vperm.xlu0 %2774, %v3621_v41  }
 0x35b   : > { %2777 = vset.pattern.permute.xlu0 %v3200_v13 }
 0x35c   : > { %1477 = vperm.xlu0 %2777, %v3621_v41  }
 0x360   : > { %2780 = vset.pattern.permute.xlu0 %v3201_v14 }
 0x361   : > { %1717 = vperm.xlu0 %2780, %v3621_v41  }
 0x365   : > { %2783 = vset.pattern.permute.xlu0 %v3202_v15  ;;  %v912_v15 = vld [vmem:[#allocation13] ss:$8 sm:$0x3] }
 0x366   : > { %1957 = vperm.xlu0 %2783, %v3621_v41   ;;  %v943_v35 = vrot.slane %v912_v15, %v3643_v58 }
 0x36a   : > { %2786 = vset.pattern.permute.xlu0 %v3192_v2 }
 0x36b   : > { %2217 = vperm.xlu0 %2786, %v2214_v23  }
 0x36f   : > { %2789 = vset.pattern.permute.xlu0 %v3198_v11  ;;  %v1084_v11 = vrot.slane %v1068_v4, %v3641_v56 }
 0x3c4   : > { %v899_v17 = vpop.xlane.xlu0 %898 }
 0x3c5   : > { %v900_v18 = vsub.f32 %v897_v10, %v899_v17  ;;  %v992_v10 = vld [vmem:[#allocation15 + $0x1] ss:$8 sm:$0x3] }
 0x3c6   : > { %v994_v17 = vld [vmem:[#allocation16 + $0x1] ss:$8 sm:$0x3] }
 0x3c7   : > { %v901_v19 = vmul.f32 1.442695, %v900_v18  ;;  %v1036_v18 = vrot.slane %v992_v10, %v3641_v56 }
 0x3c9   : > { %2794 = vpow2.f32 %v901_v19  ;;  %v1040_v19 = vrot.slane %v992_v10, %v3643_v58  ;;  %v3714_v10 = vld [vmem:[#allocation15 + $0x2] ss:$8 sm:$0x3] }
 0x3cc   : > { %v918_v60 = vpop.permute.xlu0 %917 }
 0x3cd   : > { %v931_v13 = vsub.f32 %v918_v60, %v924_v63  ;;  %v1468_v63 = vld [vmem:[#allocation12 + $0x7] ss:$8 sm:$0x3] }
 0x3d1   : > { %v1078_v14 = vpop.permute.xlu0 %1077 }
 0x3d2   : > { %v1091_v23 = vsub.f32 %v1078_v14, %v1084_v11 }
 0x3d3   : > { %v2795_v20 = vpop.eup %2794 }
 0x3d4   : > { %903 = vadd.xlane.f32.xlu1 %v2795_v20 }
 0x3e5   : > { %1317 = vperm.xlu1 %2775, %v3621_v41  }
 0x3e9   : > { %2776 = vset.pattern.permute.xlu1 %v3204_v21  ;;  %v932_v21 = vsub.f32 %v918_v60, %v928_v6  ;;  %v3712_v6 = vld [vmem:[#allocation16] ss:$8 sm:$0x3] }
 0x3ea   : > { %1397 = vperm.xlu1 %2776, %v3621_v41  }
 0x3eb   : > { %v934_v36 = vmul.f32 %v932_v21, %v932_v21  ;;  %v1484_v21 = vrot.slane %v1468_v63, %v3641_v56 }
 0x3ee   : > { %2778 = vset.pattern.permute.xlu1 %v3205_v22  ;;  %v1196_v22 = vrot.slane %v1152_v12, %v3641_v56 }
 0x3ef   : > { %1557 = vperm.xlu1 %2778, %v3621_v41  }
 0x3f3   : > { %2779 = vset.pattern.permute.xlu1 %v3206_v24  ;;  %v1200_v24 = vrot.slane %v1152_v12, %v3643_v58 }
 0x3f4   : > { %1637 = vperm.xlu1 %2779, %v3621_v41  }
 0x3f8   : > { %2781 = vset.pattern.permute.xlu1 %v3207_v26  ;;  %v939_v26 = vrot.slane %v912_v15, %v3641_v56 }
 0x3f9   : > { %1797 = vperm.xlu1 %2781, %v3621_v41  }
 0x3fd   : > { %2782 = vset.pattern.permute.xlu1 %v3208_v27  ;;  %v933_v27 = vmul.f32 %v931_v13, %v931_v13 }
 0x3fe   : > { %1877 = vperm.xlu1 %2782, %v3621_v41  }
 0x3ff   : > { %v3695_v44 = vmul.f32 %v939_v26, %v933_v27  ;;  %v3736_v26 = vld [vmem:[#allocation15 + $0x4] ss:$8 sm:$0x3] }
 0x400   : > { %v3738_v27 = vld [vmem:[#allocation16 + $0x4] ss:$8 sm:$0x3] }
 0x402   : > { %2784 = vset.pattern.permute.xlu1 %v3209_v28  ;;  %v1070_v28 = vld [vmem:[#allocation13 + $0x2] ss:$8 sm:$0x3] }
 0x403   : > { %2037 = vperm.xlu1 %2784, %v3621_v41   ;;  %v1103_v45 = vrot.slane %v1070_v28, %v3643_v58 }
 0x407   : > { %2785 = vset.pattern.permute.xlu1 %v3210_v29  ;;  %v1228_v29 = vld [vmem:[#allocation12 + $0x4] ss:$8 sm:$0x3] }
 0x408   : > { %2117 = vperm.xlu1 %2785, %v3621_v41   ;;  %v1008_v41 = vrot.slane %v988_v34, %v3643_v58  ;;  %v1244_v40 = vrot.slane %v1228_v29, %v3641_v56 }
 0x40a   : > { %v1012_v43 = vsub.f32 %v998_v3, %v1008_v41  ;;  %v1049_v3 = vrot.slane %v994_v17, %v3641_v56 }
 0x40c   : > { %2787 = vset.pattern.permute.xlu1 %v3192_v2  ;;  %v1014_v47 = vmul.f32 %v1012_v43, %v1012_v43 }
 0x40e   : > { %v1027_v52 = vmul.f32 %v1023_v46, %v1014_v47  ;;  %v1248_v47 = vrot.slane %v1228_v29, %v3643_v58  ;;  %v1120_v29 = vrot.slane %v3714_v10, %v3643_v58 }
 0x410   : > { %v1030_v61 = vmul.f32 1.442695, %v1027_v52  ;;  %v1044_v34 = vmul.f32 %v1040_v19, %v1027_v52 }
 0x461   : > { %v904_v31 = vpop.xlane.xlu1 %903 }
 0x462   : > { %2796 = vrcp.f32 %v904_v31 }
 0x463   : > { %2798 = vpow2.f32 %v1028_v7 }
 0x464   : > { %2800 = vpow2.f32 %v1030_v61 }
 0x46c   : > { %v2797_v32 = vpop.eup %2796 }
 0x46d   : > { %v906_v33 = vmul.f32 %v2797_v32, %v2795_v20  ;;  %v1154_v20 = vld [vmem:[#allocation16 + $0x3] ss:$8 sm:$0x3]  ;;  %v1092_v32 = vsub.f32 %v1078_v14, %v1088_v16  ;;  %v2799_v42 = vpop.eup %2798 }
 0x46e   : > { %v1209_v31 = vrot.slane %v1154_v20, %v3641_v56  ;;  %v1213_v43 = vrot.slane %v1154_v20, %v3643_v58  ;;  %v2801_v0 = vpop.eup %2800 }
 0x46f   : > { %2201 = vperm.xlu0 %2789, %v906_v33   ;;  %2190 = vperm.xlu1 %2787, %v906_v33   ;;  %v1094_v46 = vmul.f32 %v1092_v32, %v1092_v32  ;;  %v3744_v32 = vld [vmem:[#allocation13 + $0x7] ss:$8 sm:$0x3] }
 0x471   : > { %v3716_v11 = vmul.f32 %v1103_v45, %v1094_v46  ;;  %v1503_v46 = vrot.slane %v3744_v32, %v3643_v58 }
 0x473   : > { %2788 = vset.pattern.permute.xlu1 %v3194_v25  ;;  %2791 = vset.pattern.permute.xlu0 %v3192_v2  ;;  %v1171_v25 = vsub.f32 %v1158_v30, %v1164_v37  ;;  %v1172_v2 = vsub.f32 %v1158_v30, %v1168_v39  ;;  %v1053_v30 = vrot.slane %v994_v17, %v3643_v58  ;;  %v3725_v17 = vld [vmem:[#allocation16 + $0x2] ss:$8 sm:$0x3] }
 0x474   : > { %2195 = vperm.xlu1 %2788, %v906_v33   ;;  %v1099_v37 = vrot.slane %v1070_v28, %v3641_v56  ;;  %v1093_v39 = vmul.f32 %v1091_v23, %v1091_v23  ;;  %v973_v23 = vrot.slane %v3712_v6, %v3643_v58 }
 0x475   : > { %v1174_v50 = vmul.f32 %v1172_v2, %v1172_v2  ;;  %v1238_v2 = vpop.permute.xlu0 %1237 }
 0x476   : > { %v3703_v57 = vmul.f32 %v1099_v37, %v1093_v39  ;;  %v1251_v7 = vsub.f32 %v1238_v2, %v1244_v40  ;;  %v1252_v12 = vsub.f32 %v1238_v2, %v1248_v47  ;;  %v3753_v39 = vld [vmem:[#allocation15 + $0x7] ss:$8 sm:$0x3]  ;;  %v3767_v47 = vld [vmem:[#allocation13 + $0x12] ss:$8 sm:$0x3] }
 0x477   : > { %v1187_v55 = vmul.f32 %v1183_v49, %v1174_v50  ;;  %v3699_v49 = vmul.f32 %v943_v35, %v934_v36  ;;  %v1488_v35 = vrot.slane %v1468_v63, %v3643_v58  ;;  %v1708_v36 = vld [vmem:[#allocation12 + $0x12] ss:$8 sm:$0x3]  ;;  %v3761_v2 = vld [vmem:[#allocation16 + $0x7] ss:$8 sm:$0x3]  ;;  %v1124_v63 = vmul.f32 %v1120_v29, %v3716_v11 }
 0x478   : > { %2790 = vset.pattern.permute.xlu1 %v3197_v54  ;;  %v1173_v54 = vmul.f32 %v1171_v25, %v1171_v25  ;;  %v1253_v20 = vmul.f32 %v1251_v7, %v1251_v7 }
 0x479   : > { %2207 = vperm.xlu1 %2790, %v906_v33   ;;  %v1190_v5 = vmul.f32 1.442695, %v1187_v55  ;;  %v1043_v33 = vmul.f32 %v1036_v18, %v1026_v51  ;;  %v1204_v25 = vmul.f32 %v1200_v24, %v1187_v55  ;;  %v1057_v51 = vadd.f32 %v1053_v30, %v1044_v34  ;;  %v1230_v55 = vld [vmem:[#allocation13 + $0x4] ss:$8 sm:$0x3]  ;;  %v1478_v28 = vpop.permute.xlu0 %1477 }
 0x47a   : > { %v1186_v53 = vmul.f32 %v1179_v48, %v1173_v54  ;;  %v950_v16 = vmul.f32 1.442695, %v3699_v49  ;;  %v1108_v18 = vmul.f32 1.442695, %v3703_v57  ;;  %v1259_v19 = vrot.slane %v1230_v55, %v3641_v56 }
 0x47b   : > { %v1056_v54 = vadd.f32 %v1049_v3, %v1043_v33  ;;  %v1217_v61 = vadd.f32 %v1213_v43, %v1204_v25  ;;  %v3708_v4 = vmul.f32 %v2801_v0, %v1057_v51  ;;  %v1116_v24 = vrot.slane %v3714_v10, %v3641_v56 }
 0x47c   : > { %v1188_v62 = vmul.f32 1.442695, %v1186_v53  ;;  %v1203_v41 = vmul.f32 %v1196_v22, %v1186_v53  ;;  %v3701_v53 = vld [vmem:[#allocation15] ss:$8 sm:$0x3]  ;;  %v969_v22 = vrot.slane %v3712_v6, %v3641_v56  ;;  %v1263_v30 = vrot.slane %v1230_v55, %v3643_v58 }
 0x47d   : > { %v3705_v60 = vmul.f32 %v2799_v42, %v1056_v54  ;;  %v956_v14 = vrot.slane %v3701_v53, %v3641_v56  ;;  %v960_v15 = vrot.slane %v3701_v53, %v3643_v58  ;;  %v1110_v3 = vmul.f32 1.442695, %v3716_v11  ;;  %v3770_v54 = vld [vmem:[#allocation12 + $0x15] ss:$8 sm:$0x3]  ;;  %v1718_v7 = vpop.permute.xlu0 %1717 }
 0x47e   : > { %2802 = vpow2.f32 %v1188_v62  ;;  %v1216_v52 = vadd.f32 %v1209_v31, %v1203_v41  ;;  %v948_v62 = vmul.f32 1.442695, %v3695_v44  ;;  %v1254_v31 = vmul.f32 %v1252_v12, %v1252_v12  ;;  %v3776_v53 = vld [vmem:[#allocation15 + $0x12] ss:$8 sm:$0x3] }
 0x47f   : > { %2804 = vpow2.f32 %v1190_v5  ;;  %v1129_v33 = vrot.slane %v3725_v17, %v3641_v56  ;;  %v1133_v34 = vrot.slane %v3725_v17, %v3643_v58  ;;  %v1276_v41 = vrot.slane %v3736_v26, %v3641_v56 }
 0x480   : > { %2806 = vpow2.f32 %v948_v62  ;;  %v1266_v37 = vmul.f32 %v1259_v19, %v1253_v20  ;;  %v1491_v40 = vsub.f32 %v1478_v28, %v1484_v21  ;;  %v1280_v42 = vrot.slane %v3736_v26, %v3643_v58  ;;  %v3794_v26 = vld [vmem:[#allocation13 + $0x15] ss:$8 sm:$0x3] }
 0x481   : > { %2808 = vpow2.f32 %v950_v16  ;;  %v1289_v43 = vrot.slane %v3738_v27, %v3641_v56  ;;  %v1293_v25 = vrot.slane %v3738_v27, %v3643_v58  ;;  %v1499_v0 = vrot.slane %v3744_v32, %v3641_v56  ;;  %v3784_v16 = vld [vmem:[#allocation16 + $0x12] ss:$8 sm:$0x3] }
 0x482   : > { %2810 = vpow2.f32 %v1108_v18  ;;  %v1267_v45 = vmul.f32 %v1263_v30, %v1254_v31  ;;  %v1728_v55 = vrot.slane %v1708_v36, %v3643_v58  ;;  %v1268_v62 = vmul.f32 1.442695, %v1266_v37 }
 0x483   : > { %2812 = vpow2.f32 %v1110_v3  ;;  %v1493_v10 = vmul.f32 %v1491_v40, %v1491_v40  ;;  %v1739_v18 = vrot.slane %v3767_v47, %v3641_v56  ;;  %v1743_v19 = vrot.slane %v3767_v47, %v3643_v58  ;;  %v3798_v3 = vpop.permute.xlu1 %1317 }
 0x484   : > { %v1964_v20 = vrot.slane %v3770_v54, %v3641_v56  ;;  %v964_v31 = vmul.f32 %v960_v15, %v3699_v49  ;;  %v1123_v32 = vmul.f32 %v1116_v24, %v3703_v57  ;;  %2814 = vpow2.f32 %v1268_v62  ;;  %v3809_v49 = vld [vmem:[#allocation15 + $0x15] ss:$8 sm:$0x3] }
 0x485   : > { %v1506_v47 = vmul.f32 %v1499_v0, %v1493_v10  ;;  %v1773_v51 = vrot.slane %v3784_v16, %v3643_v58  ;;  %v1979_v57 = vrot.slane %v3794_v26, %v3641_v56  ;;  %v1283_v24 = vmul.f32 %v1276_v41, %v1266_v37 }
 0x486   : > { %v977_v11 = vadd.f32 %v973_v23, %v964_v31  ;;  %v1136_v29 = vadd.f32 %v1129_v33, %v1123_v32  ;;  %v1983_v10 = vrot.slane %v3794_v26, %v3643_v58  ;;  %v1137_v6 = vadd.f32 %v1133_v34, %v1124_v63  ;;  %v1388_v26 = vld [vmem:[#allocation12 + $0x6] ss:$8 sm:$0x3] }
 0x487   : > { %v1508_v62 = vmul.f32 1.442695, %v1506_v47  ;;  %v1398_v41 = vpop.permute.xlu1 %1397 }
 0x488   : > { %v2803_v48 = vpop.eup %2802 }
 0x489   : > { %v2805_v50 = vpop.eup %2804  ;;  %v3710_v5 = vmul.f32 %v2803_v48, %v1216_v52  ;;  %v1724_v48 = vrot.slane %v1708_v36, %v3641_v56  ;;  %v1492_v52 = vsub.f32 %v1478_v28, %v1488_v35  ;;  %v1968_v28 = vrot.slane %v3770_v54, %v3643_v58 }
 0x48a   : > { %v3718_v13 = vmul.f32 %v2805_v50, %v1217_v61  ;;  %v1516_v50 = vrot.slane %v3753_v39, %v3641_v56  ;;  %v963_v61 = vmul.f32 %v956_v14, %v3695_v44  ;;  %v1270_v44 = vmul.f32 1.442695, %v1267_v45  ;;  %v2807_v30 = vpop.eup %2806 }
 0x48b   : > { %v1756_v14 = vrot.slane %v3776_v53, %v3641_v56  ;;  %v1731_v21 = vsub.f32 %v1718_v7, %v1724_v48  ;;  %v1494_v35 = vmul.f32 %v1492_v52, %v1492_v52  ;;  %v1732_v36 = vsub.f32 %v1718_v7, %v1728_v55  ;;  %v2809_v12 = vpop.eup %2808  ;;  %v1958_v55 = vpop.permute.xlu0 %1957 }
 0x48c   : > { %v976_v40 = vadd.f32 %v969_v22, %v963_v61  ;;  %v1760_v48 = vrot.slane %v3776_v53, %v3643_v58  ;;  %v1769_v54 = vrot.slane %v3784_v16, %v3641_v56  ;;  %v2811_v15 = vpop.eup %2810  ;;  %2816 = vpow2.f32 %v1270_v44  ;;  %v1308_v44 = vld [vmem:[#allocation12 + $0x5] ss:$8 sm:$0x3] }
 0x48d   : > { %v1733_v0 = vmul.f32 %v1731_v21, %v1731_v21  ;;  %v1507_v52 = vmul.f32 %v1503_v46, %v1494_v35  ;;  %v1734_v53 = vmul.f32 %v1732_v36, %v1732_v36  ;;  %v2813_v7 = vpop.eup %2812  ;;  %v1284_v61 = vmul.f32 %v1280_v42, %v1267_v45 }
 0x48e   : > { %v978_v22 = vmul.f32 %v2807_v30, %v976_v40  ;;  %v979_v37 = vmul.f32 %v2809_v12, %v977_v11  ;;  %v1138_v23 = vmul.f32 %v2811_v15, %v1136_v29  ;;  %v1523_v33 = vmul.f32 %v1516_v50, %v1506_v47  ;;  %v2815_v36 = vpop.eup %2814  ;;  %v3946_v30 = vld [vmem:[#allocation16 + $0x11] ss:$8 sm:$0x3] }
 0x48f   : > { %v1296_v42 = vadd.f32 %v1289_v43, %v1283_v24  ;;  %v1746_v45 = vmul.f32 %v1739_v18, %v1733_v0  ;;  %v1971_v21 = vsub.f32 %v1958_v55, %v1964_v20  ;;  %v1139_v31 = vmul.f32 %v2813_v7, %v1137_v6 }
 0x490   : > { %v1062_v46 = vadd.f32 %v3705_v60, %v978_v22  ;;  %v1510_v32 = vmul.f32 1.442695, %v1507_v52  ;;  %v1747_v35 = vmul.f32 %v1743_v19, %v1734_v53  ;;  %v1324_v12 = vrot.slane %v1308_v44, %v3641_v56  ;;  %v3840_v22 = vpop.permute.xlu1 %1557 }
 0x491   : > { %v1297_v17 = vadd.f32 %v1293_v25, %v1284_v61  ;;  %2818 = vpow2.f32 %v1508_v62  ;;  %v4241_v60 = vrot.slane %v3753_v39, %v3643_v58  ;;  %v1972_v50 = vsub.f32 %v1958_v55, %v1968_v28  ;;  %v1310_v25 = vld [vmem:[#allocation13 + $0x5] ss:$8 sm:$0x3] }
 0x492   : > { %v1063_v43 = vadd.f32 %v3708_v4, %v979_v37  ;;  %v1142_v63 = vadd.f32 %v1138_v23, %v1062_v46  ;;  %v4242_v18 = vrot.slane %v3761_v2, %v3641_v56  ;;  %v1404_v19 = vrot.slane %v1388_v26, %v3641_v56  ;;  %v1548_v37 = vld [vmem:[#allocation12 + $0x10] ss:$8 sm:$0x3] }
 0x493   : > { %v1524_v34 = vmul.f32 %v4241_v60, %v1507_v52  ;;  %v1748_v40 = vmul.f32 1.442695, %v1746_v45  ;;  %v1763_v47 = vmul.f32 %v1756_v14, %v1746_v45  ;;  %v1973_v27 = vmul.f32 %v1971_v21, %v1971_v21  ;;  %v1628_v45 = vld [vmem:[#allocation12 + $0x11] ss:$8 sm:$0x3] }
 0x494   : > { %v1536_v20 = vadd.f32 %v4242_v18, %v1523_v33  ;;  %v1328_v15 = vrot.slane %v1308_v44, %v3643_v58  ;;  %v1143_v39 = vadd.f32 %v1139_v31, %v1063_v43  ;;  %2820 = vpow2.f32 %v1510_v32  ;;  %v1638_v21 = vpop.permute.xlu1 %1637 }
 0x495   : > { %v1750_v28 = vmul.f32 1.442695, %v1747_v35  ;;  %v1331_v4 = vsub.f32 %v3798_v3, %v1324_v12  ;;  %v4243_v0 = vrot.slane %v3761_v2, %v3643_v58  ;;  %v1764_v29 = vmul.f32 %v1760_v48, %v1747_v35  ;;  %v1390_v48 = vld [vmem:[#allocation13 + $0x6] ss:$8 sm:$0x3] }
 0x496   : > { %v2817_v24 = vpop.eup %2816  ;;  %v1974_v52 = vmul.f32 %v1972_v50, %v1972_v50  ;;  %v1408_v14 = vrot.slane %v1388_v26, %v3643_v58  ;;  %v1222_v53 = vadd.f32 %v3710_v5, %v1142_v63  ;;  %v1298_v55 = vmul.f32 %v2815_v36, %v1296_v42  ;;  %v3860_v5 = vld [vmem:[#allocation15 + $0x5] ss:$8 sm:$0x3]  ;;  %v3893_v63 = vld [vmem:[#allocation16 + $0x6] ss:$8 sm:$0x3] }
 0x497   : > { %v3846_v11 = vadd.f32 %v4243_v0, %v1524_v34  ;;  %v1339_v7 = vrot.slane %v1310_v25, %v3641_v56  ;;  %v1411_v61 = vsub.f32 %v1398_v41, %v1404_v19  ;;  %2822 = vpow2.f32 %v1748_v40  ;;  %v3887_v34 = vld [vmem:[#allocation15 + $0x6] ss:$8 sm:$0x3] }
 0x498   : > { %v3854_v62 = vadd.f32 %v1769_v54, %v1763_v47  ;;  %v3856_v44 = vmul.f32 %v1979_v57, %v1973_v27  ;;  %v1332_v2 = vsub.f32 %v3798_v3, %v1328_v15  ;;  %v1223_v6 = vadd.f32 %v3718_v13, %v1143_v39  ;;  %v3869_v57 = vld [vmem:[#allocation16 + $0x5] ss:$8 sm:$0x3]  ;;  %v1550_v15 = vld [vmem:[#allocation13 + $0x10] ss:$8 sm:$0x3] }
 0x499   : > { %v1299_v23 = vmul.f32 %v2817_v24, %v1297_v17  ;;  %2824 = vpow2.f32 %v1750_v28  ;;  %v1333_v33 = vmul.f32 %v1331_v4, %v1331_v4  ;;  %v3865_v46 = vadd.f32 %v1773_v51, %v1764_v29  ;;  %v3910_v24 = vld [vmem:[#allocation15 + $0x10] ss:$8 sm:$0x3]  ;;  %v2028_v27 = vld [vmem:[#allocation12 + $0x16] ss:$8 sm:$0x3] }
 0x49a   : > { %v3867_v54 = vmul.f32 %v1983_v10, %v1974_v52  ;;  %v1343_v3 = vrot.slane %v1310_v25, %v3643_v58  ;;  %v1412_v42 = vsub.f32 %v1398_v41, %v1408_v14  ;;  %v3872_v13 = vadd.f32 %v1298_v55, %v1222_v53  ;;  %v3918_v53 = vld [vmem:[#allocation16 + $0x10] ss:$8 sm:$0x3] }
 0x49b   : > { %v1419_v26 = vrot.slane %v1390_v48, %v3641_v56  ;;  %v1413_v31 = vmul.f32 %v1411_v61, %v1411_v61  ;;  %v1564_v32 = vrot.slane %v1548_v37, %v3641_v56  ;;  %v2819_v35 = vpop.eup %2818  ;;  %v1988_v51 = vmul.f32 1.442695, %v3856_v44  ;;  %v3959_v61 = vld [vmem:[#allocation15 + $0x13] ss:$8 sm:$0x3] }
 0x49c   : > { %v1356_v16 = vrot.slane %v3860_v5, %v3641_v56  ;;  %v1360_v10 = vrot.slane %v3860_v5, %v3643_v58  ;;  %v1334_v12 = vmul.f32 %v1332_v2, %v1332_v2  ;;  %v3881_v41 = vadd.f32 %v1299_v23, %v1223_v6  ;;  %v1630_v6 = vld [vmem:[#allocation13 + $0x11] ss:$8 sm:$0x3]  ;;  %v1788_v23 = vld [vmem:[#allocation12 + $0x13] ss:$8 sm:$0x3] }
 0x49d   : > { %v3885_v60 = vmul.f32 %v1339_v7, %v1333_v33  ;;  %v1644_v50 = vrot.slane %v1628_v45, %v3641_v56  ;;  %v3891_v43 = vmul.f32 1.442695, %v3867_v54  ;;  %v1423_v18 = vrot.slane %v1390_v48, %v3643_v58 }
 0x49e   : > { %v1414_v19 = vmul.f32 %v1412_v42, %v1412_v42  ;;  %v1568_v36 = vrot.slane %v1548_v37, %v3643_v58  ;;  %v3897_v40 = vpop.eup %2820  ;;  %v3899_v47 = vmul.f32 %v2819_v35, %v1536_v20  ;;  %v3903_v25 = vmul.f32 %v1419_v26, %v1413_v31  ;;  %v1798_v20 = vpop.permute.xlu1 %1797 }
 0x49f   : > { %v1571_v39 = vsub.f32 %v3840_v22, %v1564_v32  ;;  %2826 = vpow2.f32 %v1988_v51  ;;  %v3906_v28 = vmul.f32 %v1343_v3, %v1334_v12  ;;  %v1436_v4 = vrot.slane %v3887_v34, %v3641_v56  ;;  %v1868_v51 = vld [vmem:[#allocation12 + $0x14] ss:$8 sm:$0x3]  ;;  %v3939_v12 = vld [vmem:[#allocation15 + $0x11] ss:$8 sm:$0x3] }
 0x4a0   : > { %v1648_v0 = vrot.slane %v1628_v45, %v3643_v58  ;;  %v1348_v29 = vmul.f32 1.442695, %v3885_v60  ;;  %v1651_v55 = vsub.f32 %v1638_v21, %v1644_v50  ;;  %v3924_v2 = vmul.f32 %v1423_v18, %v1414_v19 }
 0x4a1   : > { %v3920_v7 = vpop.eup %2822  ;;  %v1579_v48 = vrot.slane %v1550_v15, %v3641_v56  ;;  %v1572_v37 = vsub.f32 %v3840_v22, %v1568_v36  ;;  %v1428_v3 = vmul.f32 1.442695, %v3903_v25  ;;  %v1583_v42 = vrot.slane %v1550_v15, %v3643_v58 }
 0x4a2   : > { %v1573_v26 = vmul.f32 %v1571_v39, %v1571_v39  ;;  %v1350_v31 = vmul.f32 1.442695, %v3906_v28  ;;  %v1652_v35 = vsub.f32 %v1638_v21, %v1648_v0  ;;  %2828 = vpow2.f32 %v1348_v29  ;;  %v1878_v21 = vpop.permute.xlu1 %1877  ;;  %v3951_v29 = vld [vmem:[#allocation13 + $0x13] ss:$8 sm:$0x3] }
 0x4a3   : > { %v3928_v33 = vpop.eup %2824  ;;  %v1659_v50 = vrot.slane %v1630_v6, %v3641_v56  ;;  %v1653_v18 = vmul.f32 %v1651_v55, %v1651_v55  ;;  %v1804_v19 = vrot.slane %v1788_v23, %v3641_v56  ;;  %v1430_v36 = vmul.f32 1.442695, %v3924_v2 }
 0x4a4   : > { %v1574_v39 = vmul.f32 %v1572_v37, %v1572_v37  ;;  %v1663_v22 = vrot.slane %v1630_v6, %v3643_v58  ;;  %2830 = vpow2.f32 %v1428_v3  ;;  %v3949_v0 = vmul.f32 %v1579_v48, %v1573_v26  ;;  %v3967_v26 = vld [vmem:[#allocation13 + $0x14] ss:$8 sm:$0x3]  ;;  %v3989_v6 = vld [vmem:[#allocation13 + $0x16] ss:$8 sm:$0x3] }
 0x4a5   : > { %v1808_v55 = vrot.slane %v1788_v23, %v3643_v58  ;;  %v1884_v32 = vrot.slane %v1868_v51, %v3641_v56  ;;  %2832 = vpow2.f32 %v1350_v31  ;;  %v1654_v15 = vmul.f32 %v1652_v35, %v1652_v35 }
 0x4a6   : > { %v3965_v3 = vmul.f32 %v1659_v50, %v1653_v18  ;;  %v1811_v23 = vsub.f32 %v1798_v20, %v1804_v19  ;;  %2834 = vpow2.f32 %v1430_v36  ;;  %v3971_v45 = vmul.f32 %v1583_v42, %v1574_v39  ;;  %v2038_v14 = vpop.permute.xlu1 %2037 }
 0x4a7   : > { %v1819_v35 = vrot.slane %v3951_v29, %v3641_v56  ;;  %v1888_v37 = vrot.slane %v1868_v51, %v3643_v58  ;;  %v1588_v48 = vmul.f32 1.442695, %v3949_v0  ;;  %v1823_v50 = vrot.slane %v3951_v29, %v3643_v58 }
 0x4a8   : > { %v1891_v19 = vsub.f32 %v1878_v21, %v1884_v32  ;;  %v1363_v42 = vmul.f32 %v1356_v16, %v3885_v60  ;;  %v3985_v36 = vmul.f32 %v1663_v22, %v1654_v15  ;;  %v1812_v39 = vsub.f32 %v1798_v20, %v1808_v55  ;;  %v2108_v15 = vld [vmem:[#allocation12 + $0x17] ss:$8 sm:$0x3] }
 0x4a9   : > { %v3969_v31 = vpop.eup %2826  ;;  %v1899_v51 = vrot.slane %v3967_v26, %v3641_v56  ;;  %v1668_v29 = vmul.f32 1.442695, %v3965_v3  ;;  %v1813_v52 = vmul.f32 %v1811_v23, %v1811_v23  ;;  %v1903_v32 = vrot.slane %v3967_v26, %v3643_v58 }
 0x4aa   : > { %v2044_v18 = vrot.slane %v2028_v27, %v3641_v56  ;;  %v1443_v16 = vmul.f32 %v1436_v4, %v3903_v25  ;;  %v1590_v60 = vmul.f32 1.442695, %v3971_v45  ;;  %v1892_v20 = vsub.f32 %v1878_v21, %v1888_v37  ;;  %v2118_v38 = vpop.permute.xlu1 %2117 }
 0x4ab   : > { %v2048_v22 = vrot.slane %v2028_v27, %v3643_v58  ;;  %v1364_v23 = vmul.f32 %v1360_v10, %v3906_v28  ;;  %2836 = vpow2.f32 %v1588_v48  ;;  %v1893_v26 = vmul.f32 %v1891_v19, %v1891_v19  ;;  %v4019_v48 = vld [vmem:[#allocation13 + $0x17] ss:$8 sm:$0x3] }
 0x4ac   : > { %v2829_v55 = vpop.eup %2828  ;;  %v2059_v17 = vrot.slane %v3989_v6, %v3641_v56  ;;  %v4244_v25 = vrot.slane %v3869_v57, %v3641_v56  ;;  %v1670_v21 = vmul.f32 1.442695, %v3985_v36  ;;  %v1814_v37 = vmul.f32 %v1812_v39, %v1812_v39 }
 0x4ad   : > { %v4245_v5 = vrot.slane %v3887_v34, %v3643_v58  ;;  %2838 = vpow2.f32 %v1668_v29  ;;  %v4017_v28 = vmul.f32 %v1819_v35, %v1813_v52  ;;  %v2124_v19 = vrot.slane %v2108_v15, %v3641_v56 }
 0x4ae   : > { %v1376_v4 = vadd.f32 %v4244_v25, %v1363_v42  ;;  %v2831_v59 = vpop.eup %2830  ;;  %v4246_v39 = vrot.slane %v3893_v63, %v3641_v56  ;;  %2840 = vpow2.f32 %v1590_v60  ;;  %v1894_v27 = vmul.f32 %v1892_v20, %v1892_v20 }
 0x4af   : > { %v1444_v10 = vmul.f32 %v4245_v5, %v3924_v2  ;;  %v2833_v42 = vpop.eup %2832  ;;  %v4247_v34 = vrot.slane %v3869_v57, %v3643_v58  ;;  %v4028_v29 = vmul.f32 %v1899_v51, %v1893_v26  ;;  %v2051_v52 = vsub.f32 %v2038_v14, %v2044_v18 }
 0x4b0   : > { %v1378_v25 = vmul.f32 %v2829_v55, %v1376_v4  ;;  %v1456_v8 = vadd.f32 %v4246_v39, %v1443_v16  ;;  %v2128_v35 = vrot.slane %v2108_v15, %v3643_v58  ;;  %v2835_v5 = vpop.eup %2834  ;;  %2842 = vpow2.f32 %v1670_v21 }
 0x4b1   : > { %v1377_v2 = vadd.f32 %v4247_v34, %v1364_v23  ;;  %v4031_v55 = vmul.f32 %v1823_v50, %v1814_v37  ;;  %v2139_v16 = vrot.slane %v4019_v48, %v3641_v56  ;;  %v4248_v20 = vrot.slane %v3893_v63, %v3643_v58 }
 0x4b2   : > { %v1458_v9 = vmul.f32 %v2831_v59, %v1456_v8  ;;  %v1828_v57 = vmul.f32 1.442695, %v4017_v28  ;;  %v2131_v51 = vsub.f32 %v2118_v38, %v2124_v19  ;;  %v1382_v18 = vadd.f32 %v1378_v25, %v3872_v13 }
 0x4b3   : > { %v1379_v60 = vmul.f32 %v2833_v42, %v1377_v2  ;;  %v1457_v4 = vadd.f32 %v4248_v20, %v1444_v10  ;;  %v4249_v59 = vrot.slane %v3910_v24, %v3641_v56  ;;  %v4044_v50 = vmul.f32 %v1903_v32, %v1894_v27  ;;  %v1872_v2 = vld [vmem:[#allocation15 + $0x14] ss:$8 sm:$0x3] }
 0x4b4   : > { %v2052_v15 = vsub.f32 %v2038_v14, %v2048_v22  ;;  %v4250_v26 = vrot.slane %v3939_v12, %v3641_v56  ;;  %v1908_v21 = vmul.f32 1.442695, %v4028_v29  ;;  %v2053_v37 = vmul.f32 %v2051_v52, %v2051_v52 }
 0x4b5   : > { %v1603_v8 = vmul.f32 %v4249_v59, %v3949_v0  ;;  %v1459_v23 = vmul.f32 %v2835_v5, %v1457_v4  ;;  %v1462_v10 = vadd.f32 %v1458_v9, %v1382_v18  ;;  %v1830_v13 = vmul.f32 1.442695, %v4031_v55  ;;  %v2837_v0 = vpop.eup %2836 }
 0x4b6   : > { %v1683_v63 = vmul.f32 %v4250_v26, %v3965_v3  ;;  %v2143_v19 = vrot.slane %v4019_v48, %v3643_v58  ;;  %v2132_v42 = vsub.f32 %v2118_v38, %v2128_v35  ;;  %v1383_v32 = vadd.f32 %v1379_v60, %v3881_v41  ;;  %v1874_v26 = vld [vmem:[#allocation16 + $0x14] ss:$8 sm:$0x3] }
 0x4b7   : > { %v4251_v14 = vrot.slane %v3910_v24, %v3643_v58  ;;  %2844 = vpow2.f32 %v1828_v57  ;;  %v2133_v3 = vmul.f32 %v2131_v51, %v2131_v51  ;;  %v4252_v27 = vrot.slane %v3918_v53, %v3641_v56  ;;  %v2839_v41 = vpop.eup %2838  ;;  %v1794_v57 = vld [vmem:[#allocation16 + $0x13] ss:$8 sm:$0x3] }
 0x4b8   : > { %v4253_v25 = vrot.slane %v3939_v12, %v3643_v58  ;;  %v1910_v38 = vmul.f32 1.442695, %v4044_v50  ;;  %v2054_v39 = vmul.f32 %v2052_v15, %v2052_v15  ;;  %v1463_v34 = vadd.f32 %v1459_v23, %v1383_v32  ;;  %v2841_v35 = vpop.eup %2840 }
 0x4b9   : > { %v1604_v22 = vmul.f32 %v4251_v14, %v3971_v45  ;;  %v1616_v9 = vadd.f32 %v4252_v27, %v1603_v8  ;;  %v4254_v24 = vrot.slane %v3946_v30, %v3641_v56  ;;  %2846 = vpow2.f32 %v1908_v21 }
 0x4ba   : > { %v1684_v48 = vmul.f32 %v4253_v25, %v3985_v36  ;;  %v4070_v52 = vmul.f32 %v2059_v17, %v2053_v37  ;;  %v1542_v5 = vadd.f32 %v3899_v47, %v1462_v10  ;;  %2848 = vpow2.f32 %v1830_v13  ;;  %v2843_v17 = vpop.eup %2842 }
 0x4bb   : > { %v1696_v45 = vadd.f32 %v4254_v24, %v1683_v63  ;;  %v1618_v60 = vmul.f32 %v2837_v0, %v1616_v9  ;;  %v2134_v12 = vmul.f32 %v2132_v42, %v2132_v42  ;;  %v1539_v36 = vmul.f32 %v3897_v40, %v3846_v11  ;;  %v1954_v9 = vld [vmem:[#allocation16 + $0x15] ss:$8 sm:$0x3]  ;;  %v2112_v24 = vld [vmem:[#allocation15 + $0x17] ss:$8 sm:$0x3] }
 0x4bc   : > { %v4255_v20 = vrot.slane %v3918_v53, %v3643_v58  ;;  %v1840_v51 = vrot.slane %v3959_v61, %v3643_v58  ;;  %v4080_v18 = vmul.f32 %v2139_v16, %v2133_v3  ;;  %v1916_v47 = vrot.slane %v1872_v2, %v3641_v56 }
 0x4bd   : > { %v1698_v59 = vmul.f32 %v2839_v41, %v1696_v45  ;;  %2850 = vpow2.f32 %v1910_v38  ;;  %v4256_v8 = vrot.slane %v3989_v6, %v3643_v58  ;;  %v1543_v11 = vadd.f32 %v1539_v36, %v1463_v34 }
 0x4be   : > { %v1617_v4 = vadd.f32 %v4255_v20, %v1604_v22  ;;  %v4257_v53 = vrot.slane %v3946_v30, %v3643_v58  ;;  %v2068_v16 = vmul.f32 1.442695, %v4070_v52  ;;  %v1622_v63 = vadd.f32 %v1618_v60, %v1542_v5  ;;  %v2032_v22 = vld [vmem:[#allocation15 + $0x16] ss:$8 sm:$0x3] }
 0x4bf   : > { %v4086_v15 = vmul.f32 %v4256_v8, %v2054_v39  ;;  %v1849_v21 = vrot.slane %v1794_v57, %v3641_v56  ;;  %v4258_v37 = vrot.slane %v3959_v61, %v3641_v56  ;;  %v4097_v6 = vmul.f32 %v2143_v19, %v2134_v12  ;;  %v2034_v12 = vld [vmem:[#allocation16 + $0x16] ss:$8 sm:$0x3] }
 0x4c0   : > { %v1619_v40 = vmul.f32 %v2841_v35, %v1617_v4  ;;  %v1697_v23 = vadd.f32 %v4257_v53, %v1684_v48  ;;  %2852 = vpow2.f32 %v3891_v43  ;;  %v1920_v42 = vrot.slane %v1872_v2, %v3643_v58 }
 0x4c1   : > { %v1843_v10 = vmul.f32 %v4258_v37, %v4017_v28  ;;  %v2148_v30 = vmul.f32 1.442695, %v4080_v18  ;;  %v1702_v0 = vadd.f32 %v1698_v59, %v1622_v63  ;;  %v1929_v32 = vrot.slane %v1874_v26, %v3641_v56  ;;  %v2845_v27 = vpop.eup %2844 }
 0x4c2   : > { %v1699_v13 = vmul.f32 %v2843_v17, %v1697_v23  ;;  %v1923_v14 = vmul.f32 %v1916_v47, %v4028_v29  ;;  %v2070_v3 = vmul.f32 1.442695, %v4086_v15  ;;  %v1623_v61 = vadd.f32 %v1619_v40, %v1543_v11 }
 0x4c3   : > { %v1853_v28 = vrot.slane %v1794_v57, %v3643_v58  ;;  %v1844_v19 = vmul.f32 %v1840_v51, %v4031_v55  ;;  %2854 = vpow2.f32 %v2068_v16  ;;  %v1778_v43 = vmul.f32 %v3920_v7, %v3854_v62  ;;  %v2847_v29 = vpop.eup %2846 }
 0x4c4   : > { %v1856_v25 = vadd.f32 %v1849_v21, %v1843_v10  ;;  %v1933_v48 = vrot.slane %v1874_v26, %v3643_v58  ;;  %v2150_v38 = vmul.f32 1.442695, %v4097_v6  ;;  %v1703_v39 = vadd.f32 %v1699_v13, %v1623_v61  ;;  %v2849_v45 = vpop.eup %2848 }
 0x4c5   : > { %v1924_v41 = vmul.f32 %v1920_v42, %v4044_v50  ;;  %v2076_v34 = vrot.slane %v2032_v22, %v3641_v56  ;;  %2856 = vpow2.f32 %v2148_v30  ;;  %v1936_v2 = vadd.f32 %v1929_v32, %v1923_v14  ;;  %v2218_v14 = vpop.permute.xlu0 %2217 }
 0x4c6   : > { %v1858_v55 = vmul.f32 %v2845_v27, %v1856_v25  ;;  %2858 = vpow2.f32 %v2070_v3  ;;  %v1782_v35 = vadd.f32 %v1778_v43, %v1702_v0  ;;  %v1779_v62 = vmul.f32 %v3928_v33, %v3865_v46  ;;  %v2114_v33 = vld [vmem:[#allocation16 + $0x17] ss:$8 sm:$0x3] }
 0x4c7   : > { %v2000_v7 = vrot.slane %v3809_v49, %v3643_v58  ;;  %v2009_v5 = vrot.slane %v1954_v9, %v3641_v56  ;;  %v1857_v60 = vadd.f32 %v1853_v28, %v1844_v19  ;;  %v2851_v50 = vpop.eup %2850  ;;  %v4259_v36 = vrot.slane %v3809_v49, %v3641_v56 }
 0x4c8   : > { %v1938_v4 = vmul.f32 %v2847_v29, %v1936_v2  ;;  %v2156_v57 = vrot.slane %v2112_v24, %v3641_v56  ;;  %2860 = vpow2.f32 %v2150_v38  ;;  %v1937_v17 = vadd.f32 %v1933_v48, %v1924_v41 }
 0x4c9   : > { %v2003_v20 = vmul.f32 %v4259_v36, %v3856_v44  ;;  %v1859_v51 = vmul.f32 %v2849_v45, %v1857_v60  ;;  %v2080_v46 = vrot.slane %v2032_v22, %v3643_v58  ;;  %v1783_v59 = vadd.f32 %v1779_v62, %v1703_v39 }
 0x4ca   : > { %v2089_v47 = vrot.slane %v2034_v12, %v3641_v56  ;;  %v2083_v8 = vmul.f32 %v2076_v34, %v4070_v52  ;;  %v1862_v11 = vadd.f32 %v1858_v55, %v1782_v35  ;;  %v2853_v40 = vpop.eup %2852  ;;  %v2013_v53 = vrot.slane %v1954_v9, %v3643_v58  ;;  %v4260_v34 = vld [vmem:[#allocation29_spill] sm:$0xff] }
 0x4cb   : > { %v2004_v49 = vmul.f32 %v2000_v7, %v3867_v54  ;;  %v1939_v44 = vmul.f32 %v2851_v50, %v1937_v17  ;;  %v2160_v23 = vrot.slane %v2112_v24, %v3643_v58  ;;  %v2016_v26 = vadd.f32 %v2009_v5, %v2003_v20 }
 0x4cc   : > { %v2163_v16 = vmul.f32 %v2156_v57, %v4080_v18  ;;  %v1942_v63 = vadd.f32 %v1938_v4, %v1862_v11  ;;  %v2169_v21 = vrot.slane %v2114_v33, %v3641_v56  ;;  %v2093_v10 = vrot.slane %v2034_v12, %v3643_v58  ;;  %v4261_v12 = vld [vmem:[#allocation28_spill] sm:$0xff]  ;;  %v4263_v57 = vld [vmem:[#allocation26_spill] sm:$0xff] }
 0x4cd   : > { %v2855_v37 = vpop.eup %2854  ;;  %v2084_v52 = vmul.f32 %v2080_v46, %v4086_v15  ;;  %v1863_v13 = vadd.f32 %v1859_v51, %v1783_v59  ;;  %v2096_v42 = vadd.f32 %v2089_v47, %v2083_v8  ;;  %v2018_v30 = vmul.f32 %v3969_v31, %v2016_v26 }
 0x4ce   : > { %v2017_v54 = vadd.f32 %v2013_v53, %v2004_v49  ;;  %v2164_v32 = vmul.f32 %v2160_v23, %v4097_v6  ;;  %v2173_v22 = vrot.slane %v2114_v33, %v3643_v58  ;;  %v2176_v28 = vadd.f32 %v2169_v21, %v2163_v16 }
 0x4cf   : > { %v2857_v0 = vpop.eup %2856  ;;  %v1943_v18 = vadd.f32 %v1939_v44, %v1863_v13  ;;  %v2022_v56 = vadd.f32 %v2018_v30, %v1942_v63  ;;  %v2098_v61 = vmul.f32 %v2855_v37, %v2096_v42  ;;  %v2097_v19 = vadd.f32 %v2093_v10, %v2084_v52 }
 0x4d0   : > { %v2859_v3 = vpop.eup %2858  ;;  %v2019_v43 = vmul.f32 %v2853_v40, %v2017_v54  ;;  %v2178_v9 = vmul.f32 %v2857_v0, %v2176_v28  ;;  %v2177_v48 = vadd.f32 %v2173_v22, %v2164_v32  ;;  %2862 = vrcp.f32 %v2218_v14 }
 0x4d1   : > { %v2099_v25 = vmul.f32 %v2859_v3, %v2097_v19  ;;  %v2102_v38 = vadd.f32 %v2098_v61, %v2022_v56 }
 0x4d2   : > { %v2861_v15 = vpop.eup %2860  ;;  %v2023_v31 = vadd.f32 %v2019_v43, %v1943_v18 }
 0x4d3   : > { %v2179_v6 = vmul.f32 %v2861_v15, %v2177_v48  ;;  %v2182_v41 = vadd.f32 %v2178_v9, %v2102_v38 }
 0x4d4   : > { %v2103_v45 = vadd.f32 %v2099_v25, %v2023_v31 }
 0x4d6   : > { %v2183_v35 = vadd.f32 %v2179_v6, %v2103_v45 }
 0x4da   : > { %v2863_v36 = vpop.eup %2862 }
 0x4ee   : > { %v2191_v27 = vpop.permute.xlu1 %2190  ;;  %v2202_v29 = vpop.permute.xlu0 %2201 }
 0x4ef   : > { %v2193_v58 = vmul.f32 %v2191_v27, %v3647_v1  ;;  %v2204_v55 = vmul.f32 %v2202_v29, %v2182_v41  ;;  %v4262_v1 = vld [vmem:[#allocation27_spill] sm:$0xff] }
 0x4f3   : > { %v2196_v39 = vpop.permute.xlu1 %2195 }
 0x4f4   : > { %v2198_v24 = vmul.f32 %v2196_v39, %v4260_v34 }
 0x4f6   : > { %v2199_v2 = vadd.f32 %v2198_v24, %v2193_v58 }
 0x4f8   : > { %v2208_v62 = vpop.permute.xlu1 %2207  ;;  %v2205_v7 = vadd.f32 %v2204_v55, %v2199_v2 }
 0x4f9   : > { %v2210_v5 = vmul.f32 %v2208_v62, %v2183_v35 }
 0x4fb   : > { %v2211_v60 = vadd.f32 %v2210_v5, %v2205_v7 }
 0x4fd   : > { %v2213_v50 = vsub.f32 %v2211_v60, %v4261_v12 }
 0x4ff   : > { %v2221_v20 = vmul.f32 %v2863_v36, %v2213_v50 }
 0x501   : > { %v2222_v4 = vmul.f32 %v2221_v20, %v4262_v1 }
 0x503   : > { %v2223_v51 = vadd.f32 %v2222_v4, %v4263_v57 }
 0x505   : > { %2224 = vst [vmem:[%s471_s17] sm:$0xff] %v2223_v51 }
 0x506   : > { %3105 = shalt.err (!%p3102_p8)
}
 0x507   : > { %s3106_s26 = scalar_lea.hbm %s4146_s28, 128  ;;  %s3110_s13 = scalar_lea.hbm %s4264_s9, 256 }
 0x508   : > { %p3107_p5 = scmp.ne.s32.totalorder %s4146_s28, %s3106_s26  ;;  %p3111_p11 = scmp.lt.u32.totalorder %s4146_s28, %s4264_s9 }
 0x509   : > { %p3112_p12 = scmp.lt.u32.totalorder %s3110_s13, %s3106_s26  ;;  %p3114_p7 = scmp.lt.u32.totalorder %s3106_s26, %s4146_s28 }
 0x50a   : > { %p3108_p10 = pnand %p3107_p5, %p4265_p9 }
 0x50b   : > { %p3113_p13 = por %p3112_p12, %p3111_p11 }
 0x50c   : > { %p3109_p1 = pneg %p3108_p10 }
 0x50d   : > { %p3115_p0 = por %p3114_p7, %p3113_p13 }
 0x50f   : > { %p3116_p2 = pnand %p3115_p0, %p3109_p1 }
 0x511   : > { %3119 = shalt.err (!%p3116_p2)
}
 0x512   : > { %2662 = dma.vmem_to_hbm [thread:$0]  (%p4265_p9), %s4148_s22, 128, %s4146_s28, %s2226_s29  }
 0x513 PF: > { %s2251_s6 = sand.u32 1, %s3166_s30   ;;  %p4266_p3 = scmp.ne.s32.totalorder %s4225_s20, 0 }
 0x514   : > { %p4267_p6 = scmp.ge.s32.totalorder %s3178_s12, 2  ;;  %s2252_s3 = scalar_lea.sflag [#allocation6], %s2251_s6 }
 0x516   : > { %p2691_p4 = pnand %p4267_p6, %p4266_p3 }
 0x518   : > { %3161 = dma.done.wait (!%p2691_p4), %s2252_s3, 128  }
 0x519   : > { %3163 = vsyncadd (!%p2691_p4), %s2252_s3, 4294967168  ;;  %p28_p8 = scmp.ge.s32.totalorder %s3446_s27, 4   ;;  %s4268_s30 = smov %s3170_s10 }
 0x51a   : > { %s4269_s10 = smov %s3174_s11  ;;  %s4270_s11 = smov %s3457_s21 }
 0x51b   : > { %s4271_s12 = smov %s3446_s27  ;;  %30 = sbr.rel (!%p28_p8) target bundleno = 17 (0x11), region = 198 }
 0x522   :  { %2257 = vsyncpa [#allocation5], 1 }
 0x523   :  { %2259 = vsyncpa [#allocation5 + $0x1], 1 }
 0x524   :  { %2260 = vsyncpa [#allocation8], 1 }
 0x525   :  { %2262 = vsyncpa [#allocation8 + $0x1], 1 }
 0x526   :  { %2263 = vsyncpa [#allocation11], 1 }
 0x527   :  { %2264 = vsyncpa [#allocation14], 1 }
 0x528   :  { %2265 = vsyncpa [#allocation17], 1 }
 0x529   :  { %2266 = vsyncpa [#allocation6], 1 }
 0x52a   :  { %2268 = vsyncpa [#allocation6 + $0x1], 1 }

</bundles_post_ra>
